<compile_context>
chip_gen: v7x
topology: tpu7x:2x2x1
jax: 0.10.0
libtpu: 0.0.40
codegen_flags: <defaults>
</compile_context>

<pallas_src>
import functools
import math

import jax
import jax.numpy as jnp
from jax.experimental import pallas as pl
from jax.experimental.pallas import tpu as pltpu


# ----------------------------------------------------------------------------
# In-kernel helpers (operate on VMEM-resident values).
# ----------------------------------------------------------------------------
if hasattr(pl, "reciprocal"):
    def _recip(x):
        return pl.reciprocal(x, approx=True)
else:  # very old pallas fallback
    def _recip(x):
        return 1.0 / x


def _layernorm(x, g, b, eps=1e-5):
    mu = jnp.mean(x, axis=-1, keepdims=True)
    xc = x - mu
    var = jnp.mean(xc * xc, axis=-1, keepdims=True)
    return xc * jax.lax.rsqrt(var + eps) * g + b          # rsqrt-multiply, no divide


def _erf(x):
    # Abramowitz & Stegun 7.1.26 rational approximation, |err| < 1.5e-7.
    a1, a2, a3, a4, a5 = 0.254829592, -0.284496736, 1.421413741, -1.453152027, 1.061405429
    p = 0.3275911
    s = jnp.where(x >= 0.0, 1.0, -1.0)
    z = jnp.abs(x)
    t = _recip(1.0 + p * z)                                # EUP reciprocal, not a divide
    poly = ((((a5 * t + a4) * t + a3) * t + a2) * t + a1) * t
    return s * (1.0 - poly * jnp.exp(-z * z))


def _gelu_exact(x):
    return 0.5 * x * (1.0 + _erf(x * (1.0 / math.sqrt(2.0))))


def _const_spec(shape):
    zeros = (0,) * len(shape)
    return pl.BlockSpec(tuple(shape), lambda *_: zeros)


def _layer_spec(shape):
    # Stacked per-layer parameter (n_layer, ...): one layer-slab per grid step.
    tail = (0,) * (len(shape) - 1)
    return pl.BlockSpec((1,) + tuple(shape[1:]), lambda b, l: (l,) + tail)


# ----------------------------------------------------------------------------
# Kernel 1: fused token embedder (rtg + state + action linears, tanh,
#           modality-major layout and pos-emb add) -- one grid step per batch.
# ----------------------------------------------------------------------------
def _embed_kernel(s_ref, a_ref, r_ref, w_se, b_se, w_ret, b_ret, w_act, b_act,
                  pos_ref, o_ref, *, half):
    T = s_ref.shape[1]
    s = s_ref[0]                                           # (T, half + S)
    s_raw = s[:, :half]
    s_feat = s[:, half:]
    enc = jnp.tanh(jnp.dot(s_feat, w_se[...], preferred_element_type=jnp.float32)
                   + b_se[...])
    state_tok = jnp.concatenate([s_raw, enc], axis=-1)     # (T, C)

    # Linear(1 -> C): K=1 contraction == broadcast multiply (skip degenerate MXU op).
    rtg_tok = jnp.tanh(r_ref[0] * w_ret[...] + b_ret[...])                       # (T, C)
    act_tok = jnp.tanh(jnp.dot(a_ref[0], w_act[...],                             # col 10 of
                               preferred_element_type=jnp.float32) + b_act[...])  # w_act is 0

    # Modality-major token slab: rows [0:T]=rtg, [T:2T]=state, [2T:3T]=action.
    tok = jnp.concatenate([rtg_tok, state_tok, act_tok], axis=0)                  # (3T, C)
    o_ref[0] = tok + pos_ref[...]


def embed_tokens(states, actions, rtgs, p):
    B, T, SD = states.shape
    A = actions.shape[-1]
    C = p["pos"].shape[-1]
    half = C // 2
    TT = 3 * T
    return pl.pallas_call(
        functools.partial(_embed_kernel, half=half),
        out_shape=jax.ShapeDtypeStruct((B, TT, C), jnp.float32),
        grid_spec=pltpu.PrefetchScalarGridSpec(
            num_scalar_prefetch=0,
            grid=(B,),
            in_specs=[
                pl.BlockSpec((1, T, SD), lambda b: (b, 0, 0)),
                pl.BlockSpec((1, T, A), lambda b: (b, 0, 0)),
                pl.BlockSpec((1, T, 1), lambda b: (b, 0, 0)),
                _const_spec(p["w_se"].shape), _const_spec(p["b_se"].shape),
                _const_spec(p["w_ret"].shape), _const_spec(p["b_ret"].shape),
                _const_spec(p["w_act"].shape), _const_spec(p["b_act"].shape),
                _const_spec(p["pos"].shape),
            ],
            out_specs=pl.BlockSpec((1, TT, C), lambda b: (b, 0, 0)),
        ),
        compiler_params=pltpu.CompilerParams(dimension_semantics=("parallel",)),
    )(states, actions, rtgs, p["w_se"], p["b_se"], p["w_ret"], p["b_ret"],
      p["w_act"], p["b_act"], p["pos"])


# ----------------------------------------------------------------------------
# Kernel 2: the WHOLE transformer stack (all layers) + ln_f + state-token slice.
# grid = (batch "parallel", layer "arbitrary"); x lives in a VMEM scratch.
# ----------------------------------------------------------------------------
def _stack_kernel(tok_ref, bias_ref,
                  ln1g, ln1b, wq, bq, wk, bk, wv, bv, wp, bp,
                  ln2g, ln2b, w1, b1, w2, b2, lnfg, lnfb,
                  o_ref, x_scr, *, n_head, seq_len):
    l = pl.program_id(1)
    TT, C = x_scr.shape
    T = seq_len
    H = n_head
    D = C // H

    @pl.when(l == 0)
    def _():
        x_scr[...] = tok_ref[0]

    x = x_scr[...]

    # ---- attention sub-layer ----
    h = _layernorm(x, ln1g[0], ln1b[0])
    q = jnp.dot(h, wq[0], preferred_element_type=jnp.float32) + bq[0]   # scale pre-folded
    k = jnp.dot(h, wk[0], preferred_element_type=jnp.float32) + bk[0]
    v = jnp.dot(h, wv[0], preferred_element_type=jnp.float32) + bv[0]

    # Head-batched attention: (H, TT, D) with head as the batch dim.
    qh = jnp.stack([q[:, hh * D:(hh + 1) * D] for hh in range(H)], axis=0)
    kh = jnp.stack([k[:, hh * D:(hh + 1) * D] for hh in range(H)], axis=0)
    vh = jnp.stack([v[:, hh * D:(hh + 1) * D] for hh in range(H)], axis=0)

    s = jnp.einsum("hqd,hkd->hqk", qh, kh, preferred_element_type=jnp.float32)
    s = s + bias_ref[...]                                   # precomputed additive causal bias
    s = s - jnp.max(s, axis=-1, keepdims=True)
    e = jnp.exp(s)
    pr = e * _recip(jnp.sum(e, axis=-1, keepdims=True))     # reciprocal-multiply softmax
    yh = jnp.einsum("hqk,hkd->hqd", pr, vh, preferred_element_type=jnp.float32)

    # Output projection accumulated per head (no lane-wise head concat).
    wp_l = wp[0]                                            # (C, C)
    acc = jnp.zeros((TT, C), jnp.float32)
    for hh in range(H):
        acc = acc + jnp.dot(yh[hh], wp_l[hh * D:(hh + 1) * D, :],
                            preferred_element_type=jnp.float32)
    x = x + acc + bp[0]                                     # residual 1

    # ---- MLP sub-layer ----
    h2 = _layernorm(x, ln2g[0], ln2b[0])
    m = jnp.dot(h2, w1[0], preferred_element_type=jnp.float32) + b1[0]
    m = _gelu_exact(m)
    m = jnp.dot(m, w2[0], preferred_element_type=jnp.float32) + b2[0]
    x = x + m                                               # residual 2
    x_scr[...] = x

    @pl.when(l == pl.num_programs(1) - 1)
    def _():
        st = x[T:2 * T, :]                                  # state tokens (modality-major)
        o_ref[0] = _layernorm(st, lnfg[...], lnfb[...]).astype(o_ref.dtype)


def transformer_stack(tok, p, *, n_head, seq_len):
    B, TT, C = tok.shape
    n_layer = p["wq"].shape[0]
    T = seq_len

    layer_names = ("ln1_g", "ln1_b", "wq", "bq", "wk", "bk", "wv", "bv",
                   "wp", "bp", "ln2_g", "ln2_b", "w1", "b1", "w2", "b2")
    in_specs = [pl.BlockSpec((1, TT, C), lambda b, l: (b, 0, 0)),   # tokens
                _const_spec(p["attn_bias"].shape)]
    in_specs += [_layer_spec(p[name].shape) for name in layer_names]
    in_specs += [_const_spec(p["lnf_g"].shape), _const_spec(p["lnf_b"].shape)]

    args = [tok, p["attn_bias"]] + [p[name] for name in layer_names] + [p["lnf_g"], p["lnf_b"]]

    return pl.pallas_call(
        functools.partial(_stack_kernel, n_head=n_head, seq_len=T),
        out_shape=jax.ShapeDtypeStruct((B, T, C), jnp.float32),
        grid_spec=pltpu.PrefetchScalarGridSpec(
            num_scalar_prefetch=0,
            grid=(B, n_layer),
            in_specs=in_specs,
            out_specs=pl.BlockSpec((1, T, C), lambda b, l: (b, 0, 0)),
            scratch_shapes=[pltpu.VMEM((TT, C), jnp.float32)],
        ),
        compiler_params=pltpu.CompilerParams(
            dimension_semantics=("parallel", "arbitrary"),
            vmem_limit_bytes=32 * 1024 * 1024,
        ),
    )(*args)


# ----------------------------------------------------------------------------
# Parameter prep: stack per-layer weights, fold the attention scale into Wq/bq,
# zero the action column at the weight level, permute pos_emb to modality-major
# order, and build the additive causal bias for that token order.
# ----------------------------------------------------------------------------
def prepare_params(params, *, n_head, seq_len):
    C = params["pos_emb"].shape[-1]
    T = seq_len
    D = C // n_head
    scale = 1.0 / math.sqrt(D)

    # actions[:, :, 10] = 0 before Linear  <=>  zero row 10 of the weight matrix.
    w_act = params["w_act"].at[10, :].set(0.0)

    # Permute pos_emb: our row (m*T + t) corresponds to original row (3t + m).
    pe = params["pos_emb"][0, :3 * T, :]
    pos_perm = pe.reshape(T, 3, C).transpose(1, 0, 2).reshape(3 * T, C)

    # Causal additive bias in the permuted (modality-major) token order.
    pos_ids = (3 * jnp.arange(T)[None, :] + jnp.arange(3)[:, None]).reshape(3 * T)
    attn_bias = jnp.where(pos_ids[:, None] >= pos_ids[None, :], 0.0, -1e30).astype(jnp.float32)

    def stack(name):
        return jnp.stack([blk[name] for blk in params["blocks"]], axis=0)

    prep = {
        "w_se": params["w_se"], "b_se": params["b_se"],
        "w_ret": params["w_ret"], "b_ret": params["b_ret"],
        "w_act": w_act, "b_act": params["b_act"],
        "pos": pos_perm, "attn_bias": attn_bias,
        "lnf_g": params["lnf_g"], "lnf_b": params["lnf_b"],
        "ln1_g": stack("ln1_g"), "ln1_b": stack("ln1_b"),
        "wq": stack("wq") * scale, "bq": stack("bq") * scale,     # fold 1/sqrt(D)
        "wk": stack("wk"), "bk": stack("bk"),
        "wv": stack("wv"), "bv": stack("bv"),
        "wp": stack("wp"), "bp": stack("bp"),
        "ln2_g": stack("ln2_g"), "ln2_b": stack("ln2_b"),
        "w1": stack("w1"), "b1": stack("b1"),
        "w2": stack("w2"), "b2": stack("b2"),
    }
    return prep


# ----------------------------------------------------------------------------
# Full ActionInference forward (reward_conditioned branch): 2 pallas_calls total.
# ----------------------------------------------------------------------------
def action_inference_forward(prep, states, actions, rtgs, *, n_head):
    B, T, _ = states.shape
    tok = embed_tokens(states.astype(jnp.float32), actions.astype(jnp.float32),
                       rtgs.astype(jnp.float32), prep)
    # TODO(synk): embd/attn/resid dropout omitted (inference; dropout reg flags off).
    return transformer_stack(tok, prep, n_head=n_head, seq_len=T)


# ----------------------------------------------------------------------------
# Pure-JAX reference (same weights, original interleaved layout) for validation.
# ----------------------------------------------------------------------------
def reference_forward(params, states, actions, rtgs, *, n_head):
    B, T, _ = states.shape
    C = params["pos_emb"].shape[-1]
    half = C // 2
    D = C // n_head

    def ln(x, g, b, eps=1e-5):
        mu = jnp.mean(x, -1, keepdims=True)
        xc = x - mu
        var = jnp.mean(xc * xc, -1, keepdims=True)
        return xc * jax.lax.rsqrt(var + eps) * g + b

    s_raw = states[..., :half]
    s_feat = states[..., half:]
    enc = jnp.tanh(s_feat @ params["w_se"] + params["b_se"])
    state_tok = jnp.concatenate([s_raw, enc], axis=-1)
    rtg_emb = jnp.tanh(rtgs @ params["w_ret"] + params["b_ret"])
    act_in = actions.at[:, :, 10].set(0.0)
    act_emb = jnp.tanh(act_in @ params["w_act"] + params["b_act"])

    tok = jnp.stack([rtg_emb, state_tok, act_emb], axis=2).reshape(B, 3 * T, C)
    x = tok + params["pos_emb"][:, :3 * T, :]

    TT = 3 * T
    causal = jnp.tril(jnp.ones((TT, TT), bool))
    for p in params["blocks"]:
        h = ln(x, p["ln1_g"], p["ln1_b"])
        q = (h @ p["wq"] + p["bq"]).reshape(B, TT, n_head, D).transpose(0, 2, 1, 3)
        k = (h @ p["wk"] + p["bk"]).reshape(B, TT, n_head, D).transpose(0, 2, 1, 3)
        v = (h @ p["wv"] + p["bv"]).reshape(B, TT, n_head, D).transpose(0, 2, 1, 3)
        att = jnp.einsum("bhqd,bhkd->bhqk", q, k) * (1.0 / math.sqrt(D))
        att = jnp.where(causal, att, -jnp.inf)
        att = jax.nn.softmax(att, axis=-1)
        y = jnp.einsum("bhqk,bhkd->bhqd", att, v)
        y = y.transpose(0, 2, 1, 3).reshape(B, TT, C)
        x = x + y @ p["wp"] + p["bp"]
        h2 = ln(x, p["ln2_g"], p["ln2_b"])
        m = jax.nn.gelu(h2 @ p["w1"] + p["b1"], approximate=False)
        x = x + m @ p["w2"] + p["b2"]

    x = ln(x, params["lnf_g"], params["lnf_b"])
    return x[:, 1::3, :]


# ----------------------------------------------------------------------------
# Deterministic parameter construction (PyTorch-style init: N(0, 0.02) weights,
# zero biases, unit/zero LN params).
# ----------------------------------------------------------------------------
def init_params(key, *, n_embd, n_layer, vocab_size, num_state_feats, block_size_tokens):
    std = 0.02
    keys = jax.random.split(key, 8 + n_layer)
    lin = lambda k, fi, fo: (jax.random.normal(k, (fi, fo), jnp.float32) * std)
    zeros = lambda n: jnp.zeros((1, n), jnp.float32)
    ones = lambda n: jnp.ones((1, n), jnp.float32)
    params = {
        # pos_emb given small random values (module inits it to zeros) so the
        # positional-add path is actually exercised; forward semantics unchanged.
        "pos_emb": jax.random.normal(keys[0], (1, block_size_tokens, n_embd), jnp.float32) * std,
        "w_se": lin(keys[1], num_state_feats, n_embd // 2), "b_se": zeros(n_embd // 2),
        "w_ret": lin(keys[2], 1, n_embd), "b_ret": zeros(n_embd),
        "w_act": lin(keys[3], vocab_size, n_embd), "b_act": zeros(n_embd),
        "lnf_g": ones(n_embd), "lnf_b": zeros(n_embd),
        "blocks": [],
    }
    for layer in range(n_layer):
        ks = jax.random.split(keys[8 + layer], 6)
        params["blocks"].append({
            "ln1_g": ones(n_embd), "ln1_b": zeros(n_embd),
            "wq": lin(ks[0], n_embd, n_embd), "bq": zeros(n_embd),
            "wk": lin(ks[1], n_embd, n_embd), "bk": zeros(n_embd),
            "wv": lin(ks[2], n_embd, n_embd), "bv": zeros(n_embd),
            "wp": lin(ks[3], n_embd, n_embd), "bp": zeros(n_embd),
            "ln2_g": ones(n_embd), "ln2_b": zeros(n_embd),
            "w1": lin(ks[4], n_embd, 4 * n_embd), "b1": zeros(4 * n_embd),
            "w2": lin(ks[5], 4 * n_embd, n_embd), "b2": zeros(n_embd),
        })
    return params


if __name__ == "__main__":
    B, T = 2, 8                      # batch, per-modality sequence length
    n_embd, n_head, n_layer = 32, 4, 2
    vocab_size = 11                  # action dim (column 10 is zeroed, per the module)
    num_state_feats = 16             # config.num_states = (1, 16) -> encoded to n_embd // 2
    block_tokens = 3 * T             # num_inputs * block_size

    root = jax.random.PRNGKey(0)
    kp, ks, ka, kr = jax.random.split(root, 4)
    params = init_params(kp, n_embd=n_embd, n_layer=n_layer, vocab_size=vocab_size,
                         num_state_feats=num_state_feats, block_size_tokens=block_tokens)

    states = jax.random.normal(ks, (B, T, n_embd // 2 + num_state_feats), jnp.float32)
    actions = jax.random.normal(ka, (B, T, vocab_size), jnp.float32)
    rtgs = jax.random.normal(kr, (B, T, 1), jnp.float32)

    prep = prepare_params(params, n_head=n_head, seq_len=T)
    fwd = jax.jit(functools.partial(action_inference_forward, n_head=n_head))
    out = fwd(prep, states, actions, rtgs)
    jax.block_until_ready(out)

    ref = reference_forward(params, states, actions, rtgs, n_head=n_head)
    assert out.shape == (B, T, n_embd)
    max_err = float(jnp.max(jnp.abs(out - ref)))
    assert jnp.allclose(out, ref, atol=1e-2, rtol=1e-2), f"mismatch vs reference: {max_err}"

    print("KERNEL_OK")
</pallas_src>

<mosaic_0001>
module attributes {stable_mosaic.version = 11 : i64} {
  func.func @_embed_kernel(%arg0: i32, %arg1: memref<1x8x32xf32, #tpu.memory_space<vmem>>, %arg2: memref<1x8x11xf32, #tpu.memory_space<vmem>>, %arg3: memref<1x8x1xf32, #tpu.memory_space<vmem>>, %arg4: memref<16x16xf32, #tpu.memory_space<vmem>>, %arg5: memref<1x16xf32, #tpu.memory_space<vmem>>, %arg6: memref<1x32xf32, #tpu.memory_space<vmem>>, %arg7: memref<1x32xf32, #tpu.memory_space<vmem>>, %arg8: memref<11x32xf32, #tpu.memory_space<vmem>>, %arg9: memref<1x32xf32, #tpu.memory_space<vmem>>, %arg10: memref<24x32xf32, #tpu.memory_space<vmem>>, %arg11: memref<1x24x32xf32, #tpu.memory_space<vmem>>) attributes {dimension_semantics = [#tpu.dimension_semantics<parallel>], iteration_bounds = array<i64: 2>, scalar_prefetch = 0 : i64, scratch_operands = 0 : i64, tpu.core_type = #tpu.core_type<tc>, window_params = [{transform_indices = @transform_0, window_bounds = array<i64: 1, 8, 32>}, {transform_indices = @transform_1, window_bounds = array<i64: 1, 8, 11>}, {transform_indices = @transform_2, window_bounds = array<i64: 1, 8, 1>}, {pipeline_mode = #tpu.pipeline_mode<synchronous>, transform_indices = @transform_3, window_bounds = array<i64: 16, 16>}, {pipeline_mode = #tpu.pipeline_mode<synchronous>, transform_indices = @transform_4, window_bounds = array<i64: 1, 16>}, {pipeline_mode = #tpu.pipeline_mode<synchronous>, transform_indices = @transform_5, window_bounds = array<i64: 1, 32>}, {pipeline_mode = #tpu.pipeline_mode<synchronous>, transform_indices = @transform_6, window_bounds = array<i64: 1, 32>}, {pipeline_mode = #tpu.pipeline_mode<synchronous>, transform_indices = @transform_7, window_bounds = array<i64: 11, 32>}, {pipeline_mode = #tpu.pipeline_mode<synchronous>, transform_indices = @transform_8, window_bounds = array<i64: 1, 32>}, {pipeline_mode = #tpu.pipeline_mode<synchronous>, transform_indices = @transform_9, window_bounds = array<i64: 24, 32>}, {transform_indices = @transform_10, window_bounds = array<i64: 1, 24, 32>}]} {
    %c0 = arith.constant 0 : index
    %c0_0 = arith.constant 0 : index
    %c0_1 = arith.constant 0 : index
    %0 = vector.load %arg1[%c0, %c0_0, %c0_1] : memref<1x8x32xf32, #tpu.memory_space<vmem>>, vector<1x8x32xf32>
    %1 = vector.shape_cast %0 : vector<1x8x32xf32> to vector<8x32xf32>
    %2 = vector.extract_strided_slice %1 {offsets = [0, 0], sizes = [8, 16], strides = [1, 1]} : vector<8x32xf32> to vector<8x16xf32>
    %3 = vector.extract_strided_slice %1 {offsets = [0, 16], sizes = [8, 16], strides = [1, 1]} : vector<8x32xf32> to vector<8x16xf32>
    %c0_2 = arith.constant 0 : index
    %c0_3 = arith.constant 0 : index
    %4 = vector.load %arg4[%c0_2, %c0_3] : memref<16x16xf32, #tpu.memory_space<vmem>>, vector<16x16xf32>
    %cst = arith.constant dense<0.000000e+00> : vector<8x16xf32>
    %5 = tpu.matmul %3, %4, %cst {dimension_numbers = #tpu.dot_dimension_numbers<[1], [0], [0], [1], [0, 0, 1, 1], [], []>} : vector<8x16xf32>, vector<16x16xf32>, vector<8x16xf32> -> vector<8x16xf32>
    %c0_4 = arith.constant 0 : index
    %c0_5 = arith.constant 0 : index
    %6 = vector.load %arg5[%c0_4, %c0_5] : memref<1x16xf32, #tpu.memory_space<vmem>>, vector<1x16xf32>
    %7 = vector.broadcast %6 : vector<1x16xf32> to vector<8x16xf32>
    %8 = arith.addf %5, %7 : vector<8x16xf32>
    %9 = math.tanh %8 : vector<8x16xf32>
    %10 = tpu.concatenate %2, %9 in 1 : vector<8x16xf32>, vector<8x16xf32> -> vector<8x32xf32>
    %c0_6 = arith.constant 0 : index
    %c0_7 = arith.constant 0 : index
    %c0_8 = arith.constant 0 : index
    %11 = vector.load %arg3[%c0_6, %c0_7, %c0_8] : memref<1x8x1xf32, #tpu.memory_space<vmem>>, vector<1x8x1xf32>
    %12 = vector.shape_cast %11 : vector<1x8x1xf32> to vector<8x1xf32>
    %c0_9 = arith.constant 0 : index
    %c0_10 = arith.constant 0 : index
    %13 = vector.load %arg6[%c0_9, %c0_10] : memref<1x32xf32, #tpu.memory_space<vmem>>, vector<1x32xf32>
    %14 = vector.broadcast %12 : vector<8x1xf32> to vector<8x32xf32>
    %15 = vector.broadcast %13 : vector<1x32xf32> to vector<8x32xf32>
    %16 = arith.mulf %14, %15 : vector<8x32xf32>
    %c0_11 = arith.constant 0 : index
    %c0_12 = arith.constant 0 : index
    %17 = vector.load %arg7[%c0_11, %c0_12] : memref<1x32xf32, #tpu.memory_space<vmem>>, vector<1x32xf32>
    %18 = vector.broadcast %17 : vector<1x32xf32> to vector<8x32xf32>
    %19 = arith.addf %16, %18 : vector<8x32xf32>
    %20 = math.tanh %19 : vector<8x32xf32>
    %c0_13 = arith.constant 0 : index
    %c0_14 = arith.constant 0 : index
    %c0_15 = arith.constant 0 : index
    %21 = vector.load %arg2[%c0_13, %c0_14, %c0_15] : memref<1x8x11xf32, #tpu.memory_space<vmem>>, vector<1x8x11xf32>
    %22 = vector.shape_cast %21 : vector<1x8x11xf32> to vector<8x11xf32>
    %c0_16 = arith.constant 0 : index
    %c0_17 = arith.constant 0 : index
    %23 = vector.load %arg8[%c0_16, %c0_17] : memref<11x32xf32, #tpu.memory_space<vmem>>, vector<11x32xf32>
    %cst_18 = arith.constant dense<0.000000e+00> : vector<8x32xf32>
    %24 = tpu.matmul %22, %23, %cst_18 {dimension_numbers = #tpu.dot_dimension_numbers<[1], [0], [0], [1], [0, 0, 1, 1], [], []>} : vector<8x11xf32>, vector<11x32xf32>, vector<8x32xf32> -> vector<8x32xf32>
    %c0_19 = arith.constant 0 : index
    %c0_20 = arith.constant 0 : index
    %25 = vector.load %arg9[%c0_19, %c0_20] : memref<1x32xf32, #tpu.memory_space<vmem>>, vector<1x32xf32>
    %26 = vector.broadcast %25 : vector<1x32xf32> to vector<8x32xf32>
    %27 = arith.addf %24, %26 : vector<8x32xf32>
    %28 = math.tanh %27 : vector<8x32xf32>
    %29 = tpu.concatenate %20, %10, %28 in 0 : vector<8x32xf32>, vector<8x32xf32>, vector<8x32xf32> -> vector<24x32xf32>
    %c0_21 = arith.constant 0 : index
    %c0_22 = arith.constant 0 : index
    %30 = vector.load %arg10[%c0_21, %c0_22] : memref<24x32xf32, #tpu.memory_space<vmem>>, vector<24x32xf32>
    %31 = arith.addf %29, %30 : vector<24x32xf32>
    %c0_23 = arith.constant 0 : index
    %c0_24 = arith.constant 0 : index
    %c0_25 = arith.constant 0 : index
    %32 = vector.load %arg11[%c0_23, %c0_24, %c0_25] : memref<1x24x32xf32, #tpu.memory_space<vmem>>, vector<1x24x32xf32>
    %33 = vector.shape_cast %32 : vector<1x24x32xf32> to vector<24x32xf32>
    %34 = vector.shape_cast %31 : vector<24x32xf32> to vector<1x24x32xf32>
    tpu.vector_store %arg11[%c0_23, %c0_24, %c0_25], %34 {strides = array<i32>} : memref<1x24x32xf32, #tpu.memory_space<vmem>>, vector<1x24x32xf32>,
    return
  }
  func.func @transform_0(%arg0: i32) -> (i32, i32, i32) {
    %c0_i32 = arith.constant 0 : i32
    %c0_i32_0 = arith.constant 0 : i32
    %c0_i32_1 = arith.constant 0 : i32
    return %arg0, %c0_i32, %c0_i32_0 : i32, i32, i32
  }
  func.func @transform_1(%arg0: i32) -> (i32, i32, i32) {
    %c0_i32 = arith.constant 0 : i32
    %c0_i32_0 = arith.constant 0 : i32
    %c0_i32_1 = arith.constant 0 : i32
    return %arg0, %c0_i32, %c0_i32_0 : i32, i32, i32
  }
  func.func @transform_2(%arg0: i32) -> (i32, i32, i32) {
    %c0_i32 = arith.constant 0 : i32
    %c0_i32_0 = arith.constant 0 : i32
    %c0_i32_1 = arith.constant 0 : i32
    return %arg0, %c0_i32, %c0_i32_0 : i32, i32, i32
  }
  func.func @transform_3(%arg0: i32) -> (i32, i32) {
    %c0_i32 = arith.constant 0 : i32
    %c0_i32_0 = arith.constant 0 : i32
    %c0_i32_1 = arith.constant 0 : i32
    return %c0_i32, %c0_i32_0 : i32, i32
  }
  func.func @transform_4(%arg0: i32) -> (i32, i32) {
    %c0_i32 = arith.constant 0 : i32
    %c0_i32_0 = arith.constant 0 : i32
    %c0_i32_1 = arith.constant 0 : i32
    return %c0_i32, %c0_i32_0 : i32, i32
  }
  func.func @transform_5(%arg0: i32) -> (i32, i32) {
    %c0_i32 = arith.constant 0 : i32
    %c0_i32_0 = arith.constant 0 : i32
    %c0_i32_1 = arith.constant 0 : i32
    return %c0_i32, %c0_i32_0 : i32, i32
  }
  func.func @transform_6(%arg0: i32) -> (i32, i32) {
    %c0_i32 = arith.constant 0 : i32
    %c0_i32_0 = arith.constant 0 : i32
    %c0_i32_1 = arith.constant 0 : i32
    return %c0_i32, %c0_i32_0 : i32, i32
  }
  func.func @transform_7(%arg0: i32) -> (i32, i32) {
    %c0_i32 = arith.constant 0 : i32
    %c0_i32_0 = arith.constant 0 : i32
    %c0_i32_1 = arith.constant 0 : i32
    return %c0_i32, %c0_i32_0 : i32, i32
  }
  func.func @transform_8(%arg0: i32) -> (i32, i32) {
    %c0_i32 = arith.constant 0 : i32
    %c0_i32_0 = arith.constant 0 : i32
    %c0_i32_1 = arith.constant 0 : i32
    return %c0_i32, %c0_i32_0 : i32, i32
  }
  func.func @transform_9(%arg0: i32) -> (i32, i32) {
    %c0_i32 = arith.constant 0 : i32
    %c0_i32_0 = arith.constant 0 : i32
    %c0_i32_1 = arith.constant 0 : i32
    return %c0_i32, %c0_i32_0 : i32, i32
  }
  func.func @transform_10(%arg0: i32) -> (i32, i32, i32) {
    %c0_i32 = arith.constant 0 : i32
    %c0_i32_0 = arith.constant 0 : i32
    %c0_i32_1 = arith.constant 0 : i32
    return %arg0, %c0_i32, %c0_i32_0 : i32, i32, i32
  }
}

module attributes {stable_mosaic.version = 11 : i64} {
  func.func @_stack_kernel(%arg0: i32, %arg1: i32, %arg2: memref<1x24x32xf32, #tpu.memory_space<vmem>>, %arg3: memref<24x24xf32, #tpu.memory_space<vmem>>, %arg4: memref<1x1x32xf32, #tpu.memory_space<vmem>>, %arg5: memref<1x1x32xf32, #tpu.memory_space<vmem>>, %arg6: memref<1x32x32xf32, #tpu.memory_space<vmem>>, %arg7: memref<1x1x32xf32, #tpu.memory_space<vmem>>, %arg8: memref<1x32x32xf32, #tpu.memory_space<vmem>>, %arg9: memref<1x1x32xf32, #tpu.memory_space<vmem>>, %arg10: memref<1x32x32xf32, #tpu.memory_space<vmem>>, %arg11: memref<1x1x32xf32, #tpu.memory_space<vmem>>, %arg12: memref<1x32x32xf32, #tpu.memory_space<vmem>>, %arg13: memref<1x1x32xf32, #tpu.memory_space<vmem>>, %arg14: memref<1x1x32xf32, #tpu.memory_space<vmem>>, %arg15: memref<1x1x32xf32, #tpu.memory_space<vmem>>, %arg16: memref<1x32x128xf32, #tpu.memory_space<vmem>>, %arg17: memref<1x1x128xf32, #tpu.memory_space<vmem>>, %arg18: memref<1x128x32xf32, #tpu.memory_space<vmem>>, %arg19: memref<1x1x32xf32, #tpu.memory_space<vmem>>, %arg20: memref<1x32xf32, #tpu.memory_space<vmem>>, %arg21: memref<1x32xf32, #tpu.memory_space<vmem>>, %arg22: memref<1x8x32xf32, #tpu.memory_space<vmem>>, %arg23: memref<24x32xf32, #tpu.memory_space<vmem>>) attributes {dimension_semantics = [#tpu.dimension_semantics<parallel>, #tpu.dimension_semantics<arbitrary>], iteration_bounds = array<i64: 2, 2>, scalar_prefetch = 0 : i64, scratch_operands = 1 : i64, tpu.core_type = #tpu.core_type<tc>, window_params = [{transform_indices = @transform_0, window_bounds = array<i64: 1, 24, 32>}, {pipeline_mode = #tpu.pipeline_mode<synchronous>, transform_indices = @transform_1, window_bounds = array<i64: 24, 24>}, {transform_indices = @transform_2, window_bounds = array<i64: 1, 1, 32>}, {transform_indices = @transform_3, window_bounds = array<i64: 1, 1, 32>}, {transform_indices = @transform_4, window_bounds = array<i64: 1, 32, 32>}, {transform_indices = @transform_5, window_bounds = array<i64: 1, 1, 32>}, {transform_indices = @transform_6, window_bounds = array<i64: 1, 32, 32>}, {transform_indices = @transform_7, window_bounds = array<i64: 1, 1, 32>}, {transform_indices = @transform_8, window_bounds = array<i64: 1, 32, 32>}, {transform_indices = @transform_9, window_bounds = array<i64: 1, 1, 32>}, {transform_indices = @transform_10, window_bounds = array<i64: 1, 32, 32>}, {transform_indices = @transform_11, window_bounds = array<i64: 1, 1, 32>}, {transform_indices = @transform_12, window_bounds = array<i64: 1, 1, 32>}, {transform_indices = @transform_13, window_bounds = array<i64: 1, 1, 32>}, {transform_indices = @transform_14, window_bounds = array<i64: 1, 32, 128>}, {transform_indices = @transform_15, window_bounds = array<i64: 1, 1, 128>}, {transform_indices = @transform_16, window_bounds = array<i64: 1, 128, 32>}, {transform_indices = @transform_17, window_bounds = array<i64: 1, 1, 32>}, {pipeline_mode = #tpu.pipeline_mode<synchronous>, transform_indices = @transform_18, window_bounds = array<i64: 1, 32>}, {pipeline_mode = #tpu.pipeline_mode<synchronous>, transform_indices = @transform_19, window_bounds = array<i64: 1, 32>}, {transform_indices = @transform_20, window_bounds = array<i64: 1, 8, 32>}]} {
    %c0_i32 = arith.constant 0 : i32
    %0 = arith.cmpi eq, %arg1, %c0_i32 : i32
    %1 = arith.extui %0 : i1 to i32
    %c0_i32_0 = arith.constant 0 : i32
    %2 = arith.cmpi ne, %1, %c0_i32_0 : i32
    scf.if %2 {
      %c0_93 = arith.constant 0 : index
      %c0_94 = arith.constant 0 : index
      %c0_95 = arith.constant 0 : index
      %203 = vector.load %arg2[%c0_93, %c0_94, %c0_95] : memref<1x24x32xf32, #tpu.memory_space<vmem>>, vector<1x24x32xf32>
      %204 = vector.shape_cast %203 : vector<1x24x32xf32> to vector<24x32xf32>
      %c0_96 = arith.constant 0 : index
      %c0_97 = arith.constant 0 : index
      %205 = vector.load %arg23[%c0_96, %c0_97] : memref<24x32xf32, #tpu.memory_space<vmem>>, vector<24x32xf32>
      tpu.vector_store %arg23[%c0_96, %c0_97], %204 {strides = array<i32>} : memref<24x32xf32, #tpu.memory_space<vmem>>, vector<24x32xf32>,
    } else {
    }
    %c0 = arith.constant 0 : index
    %c0_1 = arith.constant 0 : index
    %3 = vector.load %arg23[%c0, %c0_1] : memref<24x32xf32, #tpu.memory_space<vmem>>, vector<24x32xf32>
    %c0_2 = arith.constant 0 : index
    %c0_3 = arith.constant 0 : index
    %c0_4 = arith.constant 0 : index
    %4 = vector.load %arg4[%c0_2, %c0_3, %c0_4] : memref<1x1x32xf32, #tpu.memory_space<vmem>>, vector<1x1x32xf32>
    %5 = vector.shape_cast %4 : vector<1x1x32xf32> to vector<1x32xf32>
    %c0_5 = arith.constant 0 : index
    %c0_6 = arith.constant 0 : index
    %c0_7 = arith.constant 0 : index
    %6 = vector.load %arg5[%c0_5, %c0_6, %c0_7] : memref<1x1x32xf32, #tpu.memory_space<vmem>>, vector<1x1x32xf32>
    %7 = vector.shape_cast %6 : vector<1x1x32xf32> to vector<1x32xf32>
    %cst = arith.constant dense<0.000000e+00> : vector<24xf32>
    %8 = vector.multi_reduction <add>, %3, %cst [1] : vector<24x32xf32> to vector<24xf32>
    %9 = vector.shape_cast %8 : vector<24xf32> to vector<24x1xf32>
    %cst_8 = arith.constant 3.200000e+01 : f32
    %10 = vector.broadcast %cst_8 : f32 to vector<24x1xf32>
    %11 = arith.divf %9, %10 : vector<24x1xf32>
    %12 = vector.broadcast %11 : vector<24x1xf32> to vector<24x32xf32>
    %13 = arith.subf %3, %12 : vector<24x32xf32>
    %14 = arith.mulf %13, %13 : vector<24x32xf32>
    %cst_9 = arith.constant dense<0.000000e+00> : vector<24xf32>
    %15 = vector.multi_reduction <add>, %14, %cst_9 [1] : vector<24x32xf32> to vector<24xf32>
    %16 = vector.shape_cast %15 : vector<24xf32> to vector<24x1xf32>
    %cst_10 = arith.constant 3.200000e+01 : f32
    %17 = vector.broadcast %cst_10 : f32 to vector<24x1xf32>
    %18 = arith.divf %16, %17 : vector<24x1xf32>
    %cst_11 = arith.constant 9.99999974E-6 : f32
    %19 = vector.broadcast %cst_11 : f32 to vector<24x1xf32>
    %20 = arith.addf %18, %19 : vector<24x1xf32>
    %21 = math.rsqrt %20 : vector<24x1xf32>
    %22 = vector.broadcast %21 : vector<24x1xf32> to vector<24x32xf32>
    %23 = arith.mulf %13, %22 : vector<24x32xf32>
    %24 = vector.broadcast %5 : vector<1x32xf32> to vector<24x32xf32>
    %25 = arith.mulf %23, %24 : vector<24x32xf32>
    %26 = vector.broadcast %7 : vector<1x32xf32> to vector<24x32xf32>
    %27 = arith.addf %25, %26 : vector<24x32xf32>
    %c0_12 = arith.constant 0 : index
    %c0_13 = arith.constant 0 : index
    %c0_14 = arith.constant 0 : index
    %28 = vector.load %arg6[%c0_12, %c0_13, %c0_14] : memref<1x32x32xf32, #tpu.memory_space<vmem>>, vector<1x32x32xf32>
    %29 = vector.shape_cast %28 : vector<1x32x32xf32> to vector<32x32xf32>
    %cst_15 = arith.constant dense<0.000000e+00> : vector<24x32xf32>
    %30 = tpu.matmul %27, %29, %cst_15 {dimension_numbers = #tpu.dot_dimension_numbers<[1], [0], [0], [1], [0, 0, 1, 1], [], []>} : vector<24x32xf32>, vector<32x32xf32>, vector<24x32xf32> -> vector<24x32xf32>
    %c0_16 = arith.constant 0 : index
    %c0_17 = arith.constant 0 : index
    %c0_18 = arith.constant 0 : index
    %31 = vector.load %arg7[%c0_16, %c0_17, %c0_18] : memref<1x1x32xf32, #tpu.memory_space<vmem>>, vector<1x1x32xf32>
    %32 = vector.shape_cast %31 : vector<1x1x32xf32> to vector<1x32xf32>
    %33 = vector.broadcast %32 : vector<1x32xf32> to vector<24x32xf32>
    %34 = arith.addf %30, %33 : vector<24x32xf32>
    %c0_19 = arith.constant 0 : index
    %c0_20 = arith.constant 0 : index
    %c0_21 = arith.constant 0 : index
    %35 = vector.load %arg8[%c0_19, %c0_20, %c0_21] : memref<1x32x32xf32, #tpu.memory_space<vmem>>, vector<1x32x32xf32>
    %36 = vector.shape_cast %35 : vector<1x32x32xf32> to vector<32x32xf32>
    %cst_22 = arith.constant dense<0.000000e+00> : vector<24x32xf32>
    %37 = tpu.matmul %27, %36, %cst_22 {dimension_numbers = #tpu.dot_dimension_numbers<[1], [0], [0], [1], [0, 0, 1, 1], [], []>} : vector<24x32xf32>, vector<32x32xf32>, vector<24x32xf32> -> vector<24x32xf32>
    %c0_23 = arith.constant 0 : index
    %c0_24 = arith.constant 0 : index
    %c0_25 = arith.constant 0 : index
    %38 = vector.load %arg9[%c0_23, %c0_24, %c0_25] : memref<1x1x32xf32, #tpu.memory_space<vmem>>, vector<1x1x32xf32>
    %39 = vector.shape_cast %38 : vector<1x1x32xf32> to vector<1x32xf32>
    %40 = vector.broadcast %39 : vector<1x32xf32> to vector<24x32xf32>
    %41 = arith.addf %37, %40 : vector<24x32xf32>
    %c0_26 = arith.constant 0 : index
    %c0_27 = arith.constant 0 : index
    %c0_28 = arith.constant 0 : index
    %42 = vector.load %arg10[%c0_26, %c0_27, %c0_28] : memref<1x32x32xf32, #tpu.memory_space<vmem>>, vector<1x32x32xf32>
    %43 = vector.shape_cast %42 : vector<1x32x32xf32> to vector<32x32xf32>
    %cst_29 = arith.constant dense<0.000000e+00> : vector<24x32xf32>
    %44 = tpu.matmul %27, %43, %cst_29 {dimension_numbers = #tpu.dot_dimension_numbers<[1], [0], [0], [1], [0, 0, 1, 1], [], []>} : vector<24x32xf32>, vector<32x32xf32>, vector<24x32xf32> -> vector<24x32xf32>
    %c0_30 = arith.constant 0 : index
    %c0_31 = arith.constant 0 : index
    %c0_32 = arith.constant 0 : index
    %45 = vector.load %arg11[%c0_30, %c0_31, %c0_32] : memref<1x1x32xf32, #tpu.memory_space<vmem>>, vector<1x1x32xf32>
    %46 = vector.shape_cast %45 : vector<1x1x32xf32> to vector<1x32xf32>
    %47 = vector.broadcast %46 : vector<1x32xf32> to vector<24x32xf32>
    %48 = arith.addf %44, %47 : vector<24x32xf32>
    %49 = vector.extract_strided_slice %34 {offsets = [0, 0], sizes = [24, 8], strides = [1, 1]} : vector<24x32xf32> to vector<24x8xf32>
    %50 = vector.extract_strided_slice %34 {offsets = [0, 8], sizes = [24, 8], strides = [1, 1]} : vector<24x32xf32> to vector<24x8xf32>
    %51 = vector.extract_strided_slice %34 {offsets = [0, 16], sizes = [24, 8], strides = [1, 1]} : vector<24x32xf32> to vector<24x8xf32>
    %52 = vector.extract_strided_slice %34 {offsets = [0, 24], sizes = [24, 8], strides = [1, 1]} : vector<24x32xf32> to vector<24x8xf32>
    %53 = vector.shape_cast %49 : vector<24x8xf32> to vector<1x24x8xf32>
    %54 = vector.shape_cast %50 : vector<24x8xf32> to vector<1x24x8xf32>
    %55 = vector.shape_cast %51 : vector<24x8xf32> to vector<1x24x8xf32>
    %56 = vector.shape_cast %52 : vector<24x8xf32> to vector<1x24x8xf32>
    %57 = tpu.concatenate %53, %54, %55, %56 in 0 : vector<1x24x8xf32>, vector<1x24x8xf32>, vector<1x24x8xf32>, vector<1x24x8xf32> -> vector<4x24x8xf32>
    %58 = vector.extract_strided_slice %41 {offsets = [0, 0], sizes = [24, 8], strides = [1, 1]} : vector<24x32xf32> to vector<24x8xf32>
    %59 = vector.extract_strided_slice %41 {offsets = [0, 8], sizes = [24, 8], strides = [1, 1]} : vector<24x32xf32> to vector<24x8xf32>
    %60 = vector.extract_strided_slice %41 {offsets = [0, 16], sizes = [24, 8], strides = [1, 1]} : vector<24x32xf32> to vector<24x8xf32>
    %61 = vector.extract_strided_slice %41 {offsets = [0, 24], sizes = [24, 8], strides = [1, 1]} : vector<24x32xf32> to vector<24x8xf32>
    %62 = vector.shape_cast %58 : vector<24x8xf32> to vector<1x24x8xf32>
    %63 = vector.shape_cast %59 : vector<24x8xf32> to vector<1x24x8xf32>
    %64 = vector.shape_cast %60 : vector<24x8xf32> to vector<1x24x8xf32>
    %65 = vector.shape_cast %61 : vector<24x8xf32> to vector<1x24x8xf32>
    %66 = tpu.concatenate %62, %63, %64, %65 in 0 : vector<1x24x8xf32>, vector<1x24x8xf32>, vector<1x24x8xf32>, vector<1x24x8xf32> -> vector<4x24x8xf32>
    %67 = vector.extract_strided_slice %48 {offsets = [0, 0], sizes = [24, 8], strides = [1, 1]} : vector<24x32xf32> to vector<24x8xf32>
    %68 = vector.extract_strided_slice %48 {offsets = [0, 8], sizes = [24, 8], strides = [1, 1]} : vector<24x32xf32> to vector<24x8xf32>
    %69 = vector.extract_strided_slice %48 {offsets = [0, 16], sizes = [24, 8], strides = [1, 1]} : vector<24x32xf32> to vector<24x8xf32>
    %70 = vector.extract_strided_slice %48 {offsets = [0, 24], sizes = [24, 8], strides = [1, 1]} : vector<24x32xf32> to vector<24x8xf32>
    %71 = vector.shape_cast %67 : vector<24x8xf32> to vector<1x24x8xf32>
    %72 = vector.shape_cast %68 : vector<24x8xf32> to vector<1x24x8xf32>
    %73 = vector.shape_cast %69 : vector<24x8xf32> to vector<1x24x8xf32>
    %74 = vector.shape_cast %70 : vector<24x8xf32> to vector<1x24x8xf32>
    %75 = tpu.concatenate %71, %72, %73, %74 in 0 : vector<1x24x8xf32>, vector<1x24x8xf32>, vector<1x24x8xf32>, vector<1x24x8xf32> -> vector<4x24x8xf32>
    "tpu.trace_start"() <{level = 10 : i32, message = "hqd,hkd->hqk"}> : () -> ()
    %cst_33 = arith.constant dense<0.000000e+00> : vector<4x24x24xf32>
    %76 = tpu.matmul %57, %66, %cst_33 {dimension_numbers = #tpu.dot_dimension_numbers<[2], [2], [1], [1], [0, 0, 0, 1, 1, 1], [0], [0]>} : vector<4x24x8xf32>, vector<4x24x8xf32>, vector<4x24x24xf32> -> vector<4x24x24xf32>
    "tpu.trace_stop"() : () -> ()
    %c0_34 = arith.constant 0 : index
    %c0_35 = arith.constant 0 : index
    %77 = vector.load %arg3[%c0_34, %c0_35] : memref<24x24xf32, #tpu.memory_space<vmem>>, vector<24x24xf32>
    %78 = vector.shape_cast %77 : vector<24x24xf32> to vector<1x24x24xf32>
    %79 = vector.broadcast %78 : vector<1x24x24xf32> to vector<4x24x24xf32>
    %80 = arith.addf %76, %79 : vector<4x24x24xf32>
    %cst_36 = arith.constant dense<0xFF800000> : vector<4x24xf32>
    %81 = vector.multi_reduction <maximumf>, %80, %cst_36 [2] : vector<4x24x24xf32> to vector<4x24xf32>
    %82 = vector.shape_cast %81 : vector<4x24xf32> to vector<4x24x1xf32>
    %83 = vector.broadcast %82 : vector<4x24x1xf32> to vector<4x24x24xf32>
    %84 = arith.subf %80, %83 : vector<4x24x24xf32>
    %85 = math.exp %84 : vector<4x24x24xf32>
    %cst_37 = arith.constant dense<0.000000e+00> : vector<4x24xf32>
    %86 = vector.multi_reduction <add>, %85, %cst_37 [2] : vector<4x24x24xf32> to vector<4x24xf32>
    %87 = vector.shape_cast %86 : vector<4x24xf32> to vector<4x24x1xf32>
    %88 = tpu.reciprocal %87 {approx = true} : vector<4x24x1xf32> -> vector<4x24x1xf32>
    %89 = vector.broadcast %88 : vector<4x24x1xf32> to vector<4x24x24xf32>
    %90 = arith.mulf %85, %89 : vector<4x24x24xf32>
    "tpu.trace_start"() <{level = 10 : i32, message = "hqk,hkd->hqd"}> : () -> ()
    %cst_38 = arith.constant dense<0.000000e+00> : vector<4x24x8xf32>
    %91 = tpu.matmul %90, %75, %cst_38 {dimension_numbers = #tpu.dot_dimension_numbers<[2], [1], [1], [2], [0, 0, 0, 1, 1, 2], [0], [0]>} : vector<4x24x24xf32>, vector<4x24x8xf32>, vector<4x24x8xf32> -> vector<4x24x8xf32>
    "tpu.trace_stop"() : () -> ()
    %c0_39 = arith.constant 0 : index
    %c0_40 = arith.constant 0 : index
    %c0_41 = arith.constant 0 : index
    %92 = vector.load %arg12[%c0_39, %c0_40, %c0_41] : memref<1x32x32xf32, #tpu.memory_space<vmem>>, vector<1x32x32xf32>
    %93 = vector.shape_cast %92 : vector<1x32x32xf32> to vector<32x32xf32>
    %cst_42 = arith.constant 0.000000e+00 : f32
    %94 = vector.broadcast %cst_42 : f32 to vector<24x32xf32>
    %95 = vector.extract_strided_slice %91 {offsets = [0, 0, 0], sizes = [1, 24, 8], strides = [1, 1, 1]} : vector<4x24x8xf32> to vector<1x24x8xf32>
    %96 = vector.shape_cast %95 : vector<1x24x8xf32> to vector<24x8xf32>
    %97 = vector.extract_strided_slice %93 {offsets = [0, 0], sizes = [8, 32], strides = [1, 1]} : vector<32x32xf32> to vector<8x32xf32>
    %cst_43 = arith.constant dense<0.000000e+00> : vector<24x32xf32>
    %98 = tpu.matmul %96, %97, %cst_43 {dimension_numbers = #tpu.dot_dimension_numbers<[1], [0], [0], [1], [0, 0, 1, 1], [], []>} : vector<24x8xf32>, vector<8x32xf32>, vector<24x32xf32> -> vector<24x32xf32>
    %99 = arith.addf %94, %98 : vector<24x32xf32>
    %100 = vector.extract_strided_slice %91 {offsets = [1, 0, 0], sizes = [1, 24, 8], strides = [1, 1, 1]} : vector<4x24x8xf32> to vector<1x24x8xf32>
    %101 = vector.shape_cast %100 : vector<1x24x8xf32> to vector<24x8xf32>
    %102 = vector.extract_strided_slice %93 {offsets = [8, 0], sizes = [8, 32], strides = [1, 1]} : vector<32x32xf32> to vector<8x32xf32>
    %cst_44 = arith.constant dense<0.000000e+00> : vector<24x32xf32>
    %103 = tpu.matmul %101, %102, %cst_44 {dimension_numbers = #tpu.dot_dimension_numbers<[1], [0], [0], [1], [0, 0, 1, 1], [], []>} : vector<24x8xf32>, vector<8x32xf32>, vector<24x32xf32> -> vector<24x32xf32>
    %104 = arith.addf %99, %103 : vector<24x32xf32>
    %105 = vector.extract_strided_slice %91 {offsets = [2, 0, 0], sizes = [1, 24, 8], strides = [1, 1, 1]} : vector<4x24x8xf32> to vector<1x24x8xf32>
    %106 = vector.shape_cast %105 : vector<1x24x8xf32> to vector<24x8xf32>
    %107 = vector.extract_strided_slice %93 {offsets = [16, 0], sizes = [8, 32], strides = [1, 1]} : vector<32x32xf32> to vector<8x32xf32>
    %cst_45 = arith.constant dense<0.000000e+00> : vector<24x32xf32>
    %108 = tpu.matmul %106, %107, %cst_45 {dimension_numbers = #tpu.dot_dimension_numbers<[1], [0], [0], [1], [0, 0, 1, 1], [], []>} : vector<24x8xf32>, vector<8x32xf32>, vector<24x32xf32> -> vector<24x32xf32>
    %109 = arith.addf %104, %108 : vector<24x32xf32>
    %110 = vector.extract_strided_slice %91 {offsets = [3, 0, 0], sizes = [1, 24, 8], strides = [1, 1, 1]} : vector<4x24x8xf32> to vector<1x24x8xf32>
    %111 = vector.shape_cast %110 : vector<1x24x8xf32> to vector<24x8xf32>
    %112 = vector.extract_strided_slice %93 {offsets = [24, 0], sizes = [8, 32], strides = [1, 1]} : vector<32x32xf32> to vector<8x32xf32>
    %cst_46 = arith.constant dense<0.000000e+00> : vector<24x32xf32>
    %113 = tpu.matmul %111, %112, %cst_46 {dimension_numbers = #tpu.dot_dimension_numbers<[1], [0], [0], [1], [0, 0, 1, 1], [], []>} : vector<24x8xf32>, vector<8x32xf32>, vector<24x32xf32> -> vector<24x32xf32>
    %114 = arith.addf %109, %113 : vector<24x32xf32>
    %115 = arith.addf %3, %114 : vector<24x32xf32>
    %c0_47 = arith.constant 0 : index
    %c0_48 = arith.constant 0 : index
    %c0_49 = arith.constant 0 : index
    %116 = vector.load %arg13[%c0_47, %c0_48, %c0_49] : memref<1x1x32xf32, #tpu.memory_space<vmem>>, vector<1x1x32xf32>
    %117 = vector.shape_cast %116 : vector<1x1x32xf32> to vector<1x32xf32>
    %118 = vector.broadcast %117 : vector<1x32xf32> to vector<24x32xf32>
    %119 = arith.addf %115, %118 : vector<24x32xf32>
    %c0_50 = arith.constant 0 : index
    %c0_51 = arith.constant 0 : index
    %c0_52 = arith.constant 0 : index
    %120 = vector.load %arg14[%c0_50, %c0_51, %c0_52] : memref<1x1x32xf32, #tpu.memory_space<vmem>>, vector<1x1x32xf32>
    %121 = vector.shape_cast %120 : vector<1x1x32xf32> to vector<1x32xf32>
    %c0_53 = arith.constant 0 : index
    %c0_54 = arith.constant 0 : index
    %c0_55 = arith.constant 0 : index
    %122 = vector.load %arg15[%c0_53, %c0_54, %c0_55] : memref<1x1x32xf32, #tpu.memory_space<vmem>>, vector<1x1x32xf32>
    %123 = vector.shape_cast %122 : vector<1x1x32xf32> to vector<1x32xf32>
    %cst_56 = arith.constant dense<0.000000e+00> : vector<24xf32>
    %124 = vector.multi_reduction <add>, %119, %cst_56 [1] : vector<24x32xf32> to vector<24xf32>
    %125 = vector.shape_cast %124 : vector<24xf32> to vector<24x1xf32>
    %cst_57 = arith.constant 3.200000e+01 : f32
    %126 = vector.broadcast %cst_57 : f32 to vector<24x1xf32>
    %127 = arith.divf %125, %126 : vector<24x1xf32>
    %128 = vector.broadcast %127 : vector<24x1xf32> to vector<24x32xf32>
    %129 = arith.subf %119, %128 : vector<24x32xf32>
    %130 = arith.mulf %129, %129 : vector<24x32xf32>
    %cst_58 = arith.constant dense<0.000000e+00> : vector<24xf32>
    %131 = vector.multi_reduction <add>, %130, %cst_58 [1] : vector<24x32xf32> to vector<24xf32>
    %132 = vector.shape_cast %131 : vector<24xf32> to vector<24x1xf32>
    %cst_59 = arith.constant 3.200000e+01 : f32
    %133 = vector.broadcast %cst_59 : f32 to vector<24x1xf32>
    %134 = arith.divf %132, %133 : vector<24x1xf32>
    %cst_60 = arith.constant 9.99999974E-6 : f32
    %135 = vector.broadcast %cst_60 : f32 to vector<24x1xf32>
    %136 = arith.addf %134, %135 : vector<24x1xf32>
    %137 = math.rsqrt %136 : vector<24x1xf32>
    %138 = vector.broadcast %137 : vector<24x1xf32> to vector<24x32xf32>
    %139 = arith.mulf %129, %138 : vector<24x32xf32>
    %140 = vector.broadcast %121 : vector<1x32xf32> to vector<24x32xf32>
    %141 = arith.mulf %139, %140 : vector<24x32xf32>
    %142 = vector.broadcast %123 : vector<1x32xf32> to vector<24x32xf32>
    %143 = arith.addf %141, %142 : vector<24x32xf32>
    %c0_61 = arith.constant 0 : index
    %c0_62 = arith.constant 0 : index
    %c0_63 = arith.constant 0 : index
    %144 = vector.load %arg16[%c0_61, %c0_62, %c0_63] : memref<1x32x128xf32, #tpu.memory_space<vmem>>, vector<1x32x128xf32>
    %145 = vector.shape_cast %144 : vector<1x32x128xf32> to vector<32x128xf32>
    %cst_64 = arith.constant dense<0.000000e+00> : vector<24x128xf32>
    %146 = tpu.matmul %143, %145, %cst_64 {dimension_numbers = #tpu.dot_dimension_numbers<[1], [0], [0], [1], [0, 0, 1, 1], [], []>} : vector<24x32xf32>, vector<32x128xf32>, vector<24x128xf32> -> vector<24x128xf32>
    %c0_65 = arith.constant 0 : index
    %c0_66 = arith.constant 0 : index
    %c0_67 = arith.constant 0 : index
    %147 = vector.load %arg17[%c0_65, %c0_66, %c0_67] : memref<1x1x128xf32, #tpu.memory_space<vmem>>, vector<1x1x128xf32>
    %148 = vector.shape_cast %147 : vector<1x1x128xf32> to vector<1x128xf32>
    %149 = vector.broadcast %148 : vector<1x128xf32> to vector<24x128xf32>
    %150 = arith.addf %146, %149 : vector<24x128xf32>
    %cst_68 = arith.constant 5.000000e-01 : f32
    %151 = vector.broadcast %cst_68 : f32 to vector<24x128xf32>
    %152 = arith.mulf %151, %150 : vector<24x128xf32>
    %cst_69 = arith.constant 0.707106769 : f32
    %153 = vector.broadcast %cst_69 : f32 to vector<24x128xf32>
    %154 = arith.mulf %150, %153 : vector<24x128xf32>
    %cst_70 = arith.constant 0.000000e+00 : f32
    %155 = vector.broadcast %cst_70 : f32 to vector<24x128xf32>
    %156 = arith.cmpf oge, %154, %155 : vector<24x128xf32>
    %cst_71 = arith.constant 1.000000e+00 : f32
    %cst_72 = arith.constant -1.000000e+00 : f32
    %157 = vector.broadcast %cst_71 : f32 to vector<24x128xf32>
    %158 = vector.broadcast %cst_72 : f32 to vector<24x128xf32>
    %159 = arith.select %156, %157, %158 : vector<24x128xi1>, vector<24x128xf32>
    %160 = math.absf %154 : vector<24x128xf32>
    %cst_73 = arith.constant 0.327591091 : f32
    %161 = vector.broadcast %cst_73 : f32 to vector<24x128xf32>
    %162 = arith.mulf %161, %160 : vector<24x128xf32>
    %cst_74 = arith.constant 1.000000e+00 : f32
    %163 = vector.broadcast %cst_74 : f32 to vector<24x128xf32>
    %164 = arith.addf %163, %162 : vector<24x128xf32>
    %165 = tpu.reciprocal %164 {approx = true} : vector<24x128xf32> -> vector<24x128xf32>
    %cst_75 = arith.constant 1.06140542 : f32
    %166 = vector.broadcast %cst_75 : f32 to vector<24x128xf32>
    %167 = arith.mulf %166, %165 : vector<24x128xf32>
    %cst_76 = arith.constant -1.45315206 : f32
    %168 = vector.broadcast %cst_76 : f32 to vector<24x128xf32>
    %169 = arith.addf %167, %168 : vector<24x128xf32>
    %170 = arith.mulf %169, %165 : vector<24x128xf32>
    %cst_77 = arith.constant 1.42141378 : f32
    %171 = vector.broadcast %cst_77 : f32 to vector<24x128xf32>
    %172 = arith.addf %170, %171 : vector<24x128xf32>
    %173 = arith.mulf %172, %165 : vector<24x128xf32>
    %cst_78 = arith.constant -0.284496725 : f32
    %174 = vector.broadcast %cst_78 : f32 to vector<24x128xf32>
    %175 = arith.addf %173, %174 : vector<24x128xf32>
    %176 = arith.mulf %175, %165 : vector<24x128xf32>
    %cst_79 = arith.constant 0.254829586 : f32
    %177 = vector.broadcast %cst_79 : f32 to vector<24x128xf32>
    %178 = arith.addf %176, %177 : vector<24x128xf32>
    %179 = arith.mulf %178, %165 : vector<24x128xf32>
    %cst_80 = arith.constant 0.000000e+00 : f32
    %180 = vector.broadcast %cst_80 : f32 to vector<24x128xf32>
    %181 = arith.subf %180, %160 : vector<24x128xf32>
    %182 = arith.mulf %181, %160 : vector<24x128xf32>
    %183 = math.exp %182 : vector<24x128xf32>
    %184 = arith.mulf %179, %183 : vector<24x128xf32>
    %cst_81 = arith.constant 1.000000e+00 : f32
    %185 = vector.broadcast %cst_81 : f32 to vector<24x128xf32>
    %186 = arith.subf %185, %184 : vector<24x128xf32>
    %187 = arith.mulf %159, %186 : vector<24x128xf32>
    %cst_82 = arith.constant 1.000000e+00 : f32
    %188 = vector.broadcast %cst_82 : f32 to vector<24x128xf32>
    %189 = arith.addf %188, %187 : vector<24x128xf32>
    %190 = arith.mulf %152, %189 : vector<24x128xf32>
    %c0_83 = arith.constant 0 : index
    %c0_84 = arith.constant 0 : index
    %c0_85 = arith.constant 0 : index
    %191 = vector.load %arg18[%c0_83, %c0_84, %c0_85] : memref<1x128x32xf32, #tpu.memory_space<vmem>>, vector<1x128x32xf32>
    %192 = vector.shape_cast %191 : vector<1x128x32xf32> to vector<128x32xf32>
    %cst_86 = arith.constant dense<0.000000e+00> : vector<24x32xf32>
    %193 = tpu.matmul %190, %192, %cst_86 {dimension_numbers = #tpu.dot_dimension_numbers<[1], [0], [0], [1], [0, 0, 1, 1], [], []>} : vector<24x128xf32>, vector<128x32xf32>, vector<24x32xf32> -> vector<24x32xf32>
    %c0_87 = arith.constant 0 : index
    %c0_88 = arith.constant 0 : index
    %c0_89 = arith.constant 0 : index
    %194 = vector.load %arg19[%c0_87, %c0_88, %c0_89] : memref<1x1x32xf32, #tpu.memory_space<vmem>>, vector<1x1x32xf32>
    %195 = vector.shape_cast %194 : vector<1x1x32xf32> to vector<1x32xf32>
    %196 = vector.broadcast %195 : vector<1x32xf32> to vector<24x32xf32>
    %197 = arith.addf %193, %196 : vector<24x32xf32>
    %198 = arith.addf %119, %197 : vector<24x32xf32>
    %c0_90 = arith.constant 0 : index
    %c0_91 = arith.constant 0 : index
    %199 = vector.load %arg23[%c0_90, %c0_91] : memref<24x32xf32, #tpu.memory_space<vmem>>, vector<24x32xf32>
    tpu.vector_store %arg23[%c0_90, %c0_91], %198 {strides = array<i32>} : memref<24x32xf32, #tpu.memory_space<vmem>>, vector<24x32xf32>,
    %c1_i32 = arith.constant 1 : i32
    %200 = arith.cmpi eq, %arg1, %c1_i32 : i32
    %201 = arith.extui %200 : i1 to i32
    %c0_i32_92 = arith.constant 0 : i32
    %202 = arith.cmpi ne, %201, %c0_i32_92 : i32
    scf.if %202 {
      %203 = vector.extract_strided_slice %198 {offsets = [8, 0], sizes = [8, 32], strides = [1, 1]} : vector<24x32xf32> to vector<8x32xf32>
      %c0_93 = arith.constant 0 : index
      %c0_94 = arith.constant 0 : index
      %204 = vector.load %arg20[%c0_93, %c0_94] : memref<1x32xf32, #tpu.memory_space<vmem>>, vector<1x32xf32>
      %c0_95 = arith.constant 0 : index
      %c0_96 = arith.constant 0 : index
      %205 = vector.load %arg21[%c0_95, %c0_96] : memref<1x32xf32, #tpu.memory_space<vmem>>, vector<1x32xf32>
      %cst_97 = arith.constant dense<0.000000e+00> : vector<8xf32>
      %206 = vector.multi_reduction <add>, %203, %cst_97 [1] : vector<8x32xf32> to vector<8xf32>
      %207 = vector.shape_cast %206 : vector<8xf32> to vector<8x1xf32>
      %cst_98 = arith.constant 3.200000e+01 : f32
      %208 = vector.broadcast %cst_98 : f32 to vector<8x1xf32>
      %209 = arith.divf %207, %208 : vector<8x1xf32>
      %210 = vector.broadcast %209 : vector<8x1xf32> to vector<8x32xf32>
      %211 = arith.subf %203, %210 : vector<8x32xf32>
      %212 = arith.mulf %211, %211 : vector<8x32xf32>
      %cst_99 = arith.constant dense<0.000000e+00> : vector<8xf32>
      %213 = vector.multi_reduction <add>, %212, %cst_99 [1] : vector<8x32xf32> to vector<8xf32>
      %214 = vector.shape_cast %213 : vector<8xf32> to vector<8x1xf32>
      %cst_100 = arith.constant 3.200000e+01 : f32
      %215 = vector.broadcast %cst_100 : f32 to vector<8x1xf32>
      %216 = arith.divf %214, %215 : vector<8x1xf32>
      %cst_101 = arith.constant 9.99999974E-6 : f32
      %217 = vector.broadcast %cst_101 : f32 to vector<8x1xf32>
      %218 = arith.addf %216, %217 : vector<8x1xf32>
      %219 = math.rsqrt %218 : vector<8x1xf32>
      %220 = vector.broadcast %219 : vector<8x1xf32> to vector<8x32xf32>
      %221 = arith.mulf %211, %220 : vector<8x32xf32>
      %222 = vector.broadcast %204 : vector<1x32xf32> to vector<8x32xf32>
      %223 = arith.mulf %221, %222 : vector<8x32xf32>
      %224 = vector.broadcast %205 : vector<1x32xf32> to vector<8x32xf32>
      %225 = arith.addf %223, %224 : vector<8x32xf32>
      %c0_102 = arith.constant 0 : index
      %c0_103 = arith.constant 0 : index
      %c0_104 = arith.constant 0 : index
      %226 = vector.load %arg22[%c0_102, %c0_103, %c0_104] : memref<1x8x32xf32, #tpu.memory_space<vmem>>, vector<1x8x32xf32>
      %227 = vector.shape_cast %226 : vector<1x8x32xf32> to vector<8x32xf32>
      %228 = vector.shape_cast %225 : vector<8x32xf32> to vector<1x8x32xf32>
      tpu.vector_store %arg22[%c0_102, %c0_103, %c0_104], %228 {strides = array<i32>} : memref<1x8x32xf32, #tpu.memory_space<vmem>>, vector<1x8x32xf32>,
    } else {
    }
    return
  }
  func.func @transform_0(%arg0: i32, %arg1: i32) -> (i32, i32, i32) {
    %c0_i32 = arith.constant 0 : i32
    %c0_i32_0 = arith.constant 0 : i32
    %c0_i32_1 = arith.constant 0 : i32
    return %arg0, %c0_i32, %c0_i32_0 : i32, i32, i32
  }
  func.func @transform_1(%arg0: i32, %arg1: i32) -> (i32, i32) {
    %c0_i32 = arith.constant 0 : i32
    %c0_i32_0 = arith.constant 0 : i32
    %c0_i32_1 = arith.constant 0 : i32
    return %c0_i32, %c0_i32_0 : i32, i32
  }
  func.func @transform_2(%arg0: i32, %arg1: i32) -> (i32, i32, i32) {
    %c0_i32 = arith.constant 0 : i32
    %c0_i32_0 = arith.constant 0 : i32
    %c0_i32_1 = arith.constant 0 : i32
    return %arg1, %c0_i32, %c0_i32_0 : i32, i32, i32
  }
  func.func @transform_3(%arg0: i32, %arg1: i32) -> (i32, i32, i32) {
    %c0_i32 = arith.constant 0 : i32
    %c0_i32_0 = arith.constant 0 : i32
    %c0_i32_1 = arith.constant 0 : i32
    return %arg1, %c0_i32, %c0_i32_0 : i32, i32, i32
  }
  func.func @transform_4(%arg0: i32, %arg1: i32) -> (i32, i32, i32) {
    %c0_i32 = arith.constant 0 : i32
    %c0_i32_0 = arith.constant 0 : i32
    %c0_i32_1 = arith.constant 0 : i32
    return %arg1, %c0_i32, %c0_i32_0 : i32, i32, i32
  }
  func.func @transform_5(%arg0: i32, %arg1: i32) -> (i32, i32, i32) {
    %c0_i32 = arith.constant 0 : i32
    %c0_i32_0 = arith.constant 0 : i32
    %c0_i32_1 = arith.constant 0 : i32
    return %arg1, %c0_i32, %c0_i32_0 : i32, i32, i32
  }
  func.func @transform_6(%arg0: i32, %arg1: i32) -> (i32, i32, i32) {
    %c0_i32 = arith.constant 0 : i32
    %c0_i32_0 = arith.constant 0 : i32
    %c0_i32_1 = arith.constant 0 : i32
    return %arg1, %c0_i32, %c0_i32_0 : i32, i32, i32
  }
  func.func @transform_7(%arg0: i32, %arg1: i32) -> (i32, i32, i32) {
    %c0_i32 = arith.constant 0 : i32
    %c0_i32_0 = arith.constant 0 : i32
    %c0_i32_1 = arith.constant 0 : i32
    return %arg1, %c0_i32, %c0_i32_0 : i32, i32, i32
  }
  func.func @transform_8(%arg0: i32, %arg1: i32) -> (i32, i32, i32) {
    %c0_i32 = arith.constant 0 : i32
    %c0_i32_0 = arith.constant 0 : i32
    %c0_i32_1 = arith.constant 0 : i32
    return %arg1, %c0_i32, %c0_i32_0 : i32, i32, i32
  }
  func.func @transform_9(%arg0: i32, %arg1: i32) -> (i32, i32, i32) {
    %c0_i32 = arith.constant 0 : i32
    %c0_i32_0 = arith.constant 0 : i32
    %c0_i32_1 = arith.constant 0 : i32
    return %arg1, %c0_i32, %c0_i32_0 : i32, i32, i32
  }
  func.func @transform_10(%arg0: i32, %arg1: i32) -> (i32, i32, i32) {
    %c0_i32 = arith.constant 0 : i32
    %c0_i32_0 = arith.constant 0 : i32
    %c0_i32_1 = arith.constant 0 : i32
    return %arg1, %c0_i32, %c0_i32_0 : i32, i32, i32
  }
  func.func @transform_11(%arg0: i32, %arg1: i32) -> (i32, i32, i32) {
    %c0_i32 = arith.constant 0 : i32
    %c0_i32_0 = arith.constant 0 : i32
    %c0_i32_1 = arith.constant 0 : i32
    return %arg1, %c0_i32, %c0_i32_0 : i32, i32, i32
  }
  func.func @transform_12(%arg0: i32, %arg1: i32) -> (i32, i32, i32) {
    %c0_i32 = arith.constant 0 : i32
    %c0_i32_0 = arith.constant 0 : i32
    %c0_i32_1 = arith.constant 0 : i32
    return %arg1, %c0_i32, %c0_i32_0 : i32, i32, i32
  }
  func.func @transform_13(%arg0: i32, %arg1: i32) -> (i32, i32, i32) {
    %c0_i32 = arith.constant 0 : i32
    %c0_i32_0 = arith.constant 0 : i32
    %c0_i32_1 = arith.constant 0 : i32
    return %arg1, %c0_i32, %c0_i32_0 : i32, i32, i32
  }
  func.func @transform_14(%arg0: i32, %arg1: i32) -> (i32, i32, i32) {
    %c0_i32 = arith.constant 0 : i32
    %c0_i32_0 = arith.constant 0 : i32
    %c0_i32_1 = arith.constant 0 : i32
    return %arg1, %c0_i32, %c0_i32_0 : i32, i32, i32
  }
  func.func @transform_15(%arg0: i32, %arg1: i32) -> (i32, i32, i32) {
    %c0_i32 = arith.constant 0 : i32
    %c0_i32_0 = arith.constant 0 : i32
    %c0_i32_1 = arith.constant 0 : i32
    return %arg1, %c0_i32, %c0_i32_0 : i32, i32, i32
  }
  func.func @transform_16(%arg0: i32, %arg1: i32) -> (i32, i32, i32) {
    %c0_i32 = arith.constant 0 : i32
    %c0_i32_0 = arith.constant 0 : i32
    %c0_i32_1 = arith.constant 0 : i32
    return %arg1, %c0_i32, %c0_i32_0 : i32, i32, i32
  }
  func.func @transform_17(%arg0: i32, %arg1: i32) -> (i32, i32, i32) {
    %c0_i32 = arith.constant 0 : i32
    %c0_i32_0 = arith.constant 0 : i32
    %c0_i32_1 = arith.constant 0 : i32
    return %arg1, %c0_i32, %c0_i32_0 : i32, i32, i32
  }
  func.func @transform_18(%arg0: i32, %arg1: i32) -> (i32, i32) {
    %c0_i32 = arith.constant 0 : i32
    %c0_i32_0 = arith.constant 0 : i32
    %c0_i32_1 = arith.constant 0 : i32
    return %c0_i32, %c0_i32_0 : i32, i32
  }
  func.func @transform_19(%arg0: i32, %arg1: i32) -> (i32, i32) {
    %c0_i32 = arith.constant 0 : i32
    %c0_i32_0 = arith.constant 0 : i32
    %c0_i32_1 = arith.constant 0 : i32
    return %c0_i32, %c0_i32_0 : i32, i32
  }
  func.func @transform_20(%arg0: i32, %arg1: i32) -> (i32, i32, i32) {
    %c0_i32 = arith.constant 0 : i32
    %c0_i32_0 = arith.constant 0 : i32
    %c0_i32_1 = arith.constant 0 : i32
    return %arg0, %c0_i32, %c0_i32_0 : i32, i32, i32
  }
}

</mosaic_0001>

<bundles_post_ra>
// kernel: action_inference_forward.2
= control target key start
LH: loop header
LB: loop body
LE: loop exit
PB: predicated region body
PF: predicated region fallthrough
CT: control target
= control target key end

     0   :  { %15 = vsyncpa [#allocation3], 0  ;;  %s1097_s0 = inlined_call_operand.vmem [shape: f32[2,8,32], index: 0, kind: input, shape index: {}]   ;;  %s1098_s1 = inlined_call_operand.vmem [shape: f32[2,8,11], index: 1, kind: input, shape index: {}]   ;;  %s1099_s2 = inlined_call_operand.vmem [shape: f32[2,8,1], index: 2, kind: input, shape index: {}]   ;;  %s1100_s3 = inlined_call_operand.vmem [shape: f32[16,16], index: 3, kind: input, shape index: {}]   ;;  %s1101_s4 = inlined_call_operand.vmem [shape: f32[1,16], index: 4, kind: input, shape index: {}]   ;;  %s1102_s5 = inlined_call_operand.vmem [shape: f32[1,32], index: 5, kind: input, shape index: {}]   ;;  %s1103_s6 = inlined_call_operand.hbm [shape: f32[1,32], index: 6, kind: input, shape index: {}]   ;;  %s1104_s7 = inlined_call_operand.vmem [shape: f32[11,32], index: 7, kind: input, shape index: {}]   ;;  %s1105_s8 = inlined_call_operand.hbm [shape: f32[1,32], index: 8, kind: input, shape index: {}]   ;;  %s1106_s9 = inlined_call_operand.vmem [shape: f32[24,32], index: 9, kind: input, shape index: {}]   ;;  %s1107_s10 = inlined_call_operand.vmem [shape: f32[2,24,32], index: 10, kind: output, shape index: {}]  }
   0x1   :  { %16 = vsyncpa [#allocation5], 0  ;;  %s961_s13 = smov 0  }
   0x2 LB: > { %s967_s14 = sadd.s32 4294967295, %s895_s13   ;;  %p734_p0 = scmp.ge.s32.totalorder %s895_s13, 1  ;;  %s895_s13 = sphi %s961_s13, %s22_s13  }
   0x3   : > { %p278_p1 = scmp.lt.s32.totalorder %s895_s13, 3  ;;  %p1108_p2 = scmp.eq.s32.totalorder %s967_s14, 0 }
   0x4   : > { %s897_s16 = smov [#allocation2]   ;;  %s898_s18 = smov [#allocation4]  }
   0x5   : > { %p972_p3 = pnand %p734_p0, %p278_p1  ;;  %s300_s17 = sshll.u32 %s897_s16, 4  ;;  %s301_s17 = int_to_ptr.vmem [resolvable:$true] %s300_s17 }
   0x6   : > { %s314_s19 = sshll.u32 %s898_s18, 4  ;;  %s825_s23 = scalar_lea.hbm %s1103_s6, 16  ;;  %s984_s19 = int_to_ptr.vmem [resolvable:$true] %s314_s19 }
   0x7   : > { %s1110_s15 = scalar_select %p972_p3, 1, 0 }
   0x8   : > { %p790_p4 = pneg %p972_p3  ;;  %p826_p6 = scmp.ne.s32.totalorder %s1103_s6, %s825_s23 }
   0x9   : > { %p832_p10 = scmp.lt.u32.totalorder %s825_s23, %s1103_s6 }
   0xa   : > { %p980_p5 = pnand %p1108_p2, %p790_p4 }
   0xc   : > { %p827_p7 = pneg %p980_p5 }
   0xe   : > { %p828_p8 = pnand %p827_p7, %p826_p6 }
  0x10   : > { %p829_p9 = pneg %p828_p8 }
  0x12   : > { %p834_p11 = pnand %p832_p10, %p829_p9 }
  0x14   : > { %837 = shalt.err (!%p834_p11)
}
  0x15   : > { %s838_s28 = scalar_lea.vmem %s301_s17, 16  ;;  %s845_s29 = scalar_lea.vmem %s301_s17, 32 }
  0x16   : > { %p839_p12 = scmp.ne.s32.totalorder %s301_s17, %s838_s28  ;;  %p846_p1 = scmp.lt.s32.totalorder %s301_s17, %s301_s17 }
  0x17   : > { %p847_p4 = scmp.lt.s32.totalorder %s845_s29, %s838_s28 }
  0x18   : > { %p841_p13 = pnand %p839_p12, %p827_p7 }
  0x19   : > { %p848_p2 = por %p847_p4, %p846_p1 }
  0x1a   : > { %p842_p0 = pneg %p841_p13 }
  0x1c   : > { %p849_p3 = pnand %p848_p2, %p842_p0 }
  0x1e   : > { %852 = shalt.err (!%p849_p3)
}
  0x1f   : > { %793 = dma.hbm_to_vmem [thread:$0]  (!%p980_p5), %s1103_s6, 16, %s301_s17, [#allocation3]  }
  0x20   : > { %s853_s18 = scalar_lea.hbm %s1105_s8, 16 }
  0x21   : > { %p854_p6 = scmp.ne.s32.totalorder %s1105_s8, %s853_s18  ;;  %p860_p3 = scmp.lt.u32.totalorder %s853_s18, %s1105_s8 }
  0x23   : > { %p856_p8 = pnand %p854_p6, %p827_p7 }
  0x25   : > { %p857_p2 = pneg %p856_p8 }
  0x27   : > { %p862_p9 = pnand %p860_p3, %p857_p2 }
  0x29   : > { %865 = shalt.err (!%p862_p9)
}
  0x2a   : > { %s866_s17 = scalar_lea.vmem %s984_s19, 16  ;;  %s873_s25 = scalar_lea.vmem %s984_s19, 32 }
  0x2b   : > { %p867_p10 = scmp.ne.s32.totalorder %s984_s19, %s866_s17  ;;  %p874_p13 = scmp.lt.s32.totalorder %s984_s19, %s984_s19 }
  0x2c   : > { %p875_p0 = scmp.lt.s32.totalorder %s873_s25, %s866_s17 }
  0x2d   : > { %p869_p11 = pnand %p867_p10, %p827_p7 }
  0x2e   : > { %p876_p1 = por %p875_p0, %p874_p13 }
  0x2f   : > { %p870_p12 = pneg %p869_p11 }
  0x31   : > { %p877_p4 = pnand %p876_p1, %p870_p12 }
  0x33   : > { %880 = shalt.err (!%p877_p4)
}
  0x34   : > { %796 = dma.hbm_to_vmem [thread:$0]  (!%p980_p5), %s1105_s8, 16, %s984_s19, [#allocation5]  }
  0x35   : > { %p1112_p6 = scmp.ne.s32.totalorder %s1110_s15, 0 }
  0x36   : > { %p1113_p7 = scmp.eq.s32.totalorder (!%p1112_p6), %s967_s14, 0 }
  0x37   : > { %351 = sbr.rel (%p1112_p6) target bundleno = 531 (0x213), region = 60 }
  0x3e   : > { %886 = dma.done.wait (%p1113_p7), [#allocation3], 16   ;;  %p1114_p8 = pmov %p1113_p7 }
  0x3f   : > { %p1115_p2 = pmov %p1113_p7 }
  0x40   : > { %888 = vsyncadd (%p1114_p8), [#allocation3], 4294967280 }
  0x41   : > { %890 = dma.done.wait (%p1115_p2), [#allocation5], 16   ;;  %p1116_p3 = pmov %p1115_p2 }
  0x42   : > { %p400_p9 = scmp.lt.s32.totalorder %s967_s14, 1  ;;  %v899_v0 = vmov 0.0|0.0   ;;  %vm900_vm0 = vmmov 0   ;;  %v901_v1 = vmov 0.0   ;;  %v902_v2 = vmov 0   ;;  %v418_v4 = vld [vmem:[%s1100_s3] sm:$0xff] }
  0x43   : > { %892 = vsyncadd (%p1116_p3), [#allocation5], 4294967280  ;;  %774 = vmatprep.subr.bf16.mxu0 %v899_v0  ;;  %777 = vmatprep.subr.bf16.mxu1 %v899_v0  ;;  %vm546_vm1 = vcmask 1042432   ;;  %v419_v5 = vld [vmem:[%s1100_s3 + $0x8] sm:$0xff]  ;;  %s903_s22 = smov 112   ;;  %v533_v7 = vld [vmem:[%s1104_s7] sm:$0xff] }
  0x44   : > { %s1118_s14 = smov (!%p400_p9, %s967_s14), 1  ;;  %764 = vmatprep.mubr.msk.f32.mxu0 %vm900_vm0, %v901_v1  ;;  %771 = vmatprep.mubr.msk.f32.mxu1 %vm900_vm0, %v901_v1  ;;  %v775_v6 = vpack.c.bf16 %v419_v5, %v418_v4  ;;  %v534_v8 = vld [vmem:[%s1104_s7 + $0x8] sm:$0x7]  ;;  %vm904_vm2 = vmmov 1   ;;  %vm542_vm4 = vcmask 89088   ;;  %vm430_vm5 = vcmask 130048  }
  0x45   : > { %818 = vset.pattern.permute.xlu0 %v902_v2  ;;  %s741_s15 = sshll.u32 %s1118_s14, 3  ;;  %vm779_vm3 = vmpackc.low %vm546_vm1, %vm904_vm2  ;;  %v778_v9 = vpack.c.bf16 %v534_v8, %v533_v7  ;;  %v747_v13 = vld [vmem:[%s1102_s5] ss:$0 sm:$0xff]  ;;  %v749_v18 = vld [vmem:[#allocation4] ss:$0 sm:$0xff]  ;;  %vm627_vm6 = vcmask 261120  }
  0x46   : > { %s403_s28 = scalar_lea.vmem %s1097_s0, %s741_s15  ;;  %s411_s11 = scalar_lea.vmem %s1099_s2, %s741_s15  ;;  %776 = vmatpush3.bf16.msra.mxu0 %v775_v6  ;;  %v748_v14 = vld [vmem:[#allocation2] ss:$0 sm:$0xff]  ;;  %v623_v25 = vld [vmem:[%s1106_s9 + $0x10] sm:$0xff]  ;;  %v622_v33 = vld [vmem:[%s1106_s9 + $0x8] sm:$0xff] }
  0x47   : > { %v417_v3 = vld [vmem:[%s403_s28] sm:$0xff]  ;;  %s407_s19 = scalar_lea.vmem %s1098_s1, %s741_s15  ;;  %780 = vmatpush3.bf16.msk.msra.mxu1 %vm779_vm3, %v778_v9  ;;  %s781_s15 = smul.u32 24, %s1118_s14 }
  0x48   : > { %428 = vrot.lane.b32.xlu0 %v417_v3, %s903_s22  ;;  %v509_v10 = vld [vmem:[%s411_s11] sm:$0xff]  ;;  %s905_s23 = smov 16  }
  0x49   : > { %v532_v11 = vld [vmem:[%s407_s19] sm:$0xff]  ;;  %s416_s16 = scalar_lea.vmem %s1107_s10, %s781_s15 }
  0x4a   : > { %772 = vmatmul.mubr.msk.f32.vlgmr.msra.gmra.mrb[0].mxu1 %vm542_vm4, %v532_v11  ;;  %v621_v22 = vld [vmem:[%s1106_s9] sm:$0xff] }
  0x4b   : > { %v745_v28 = vld [vmem:[%s1101_s4] ss:$0 sm:$0xff] }
  0x4c   : > { %513 = vperm.xlu0 %818, %v509_v10  }
  0xba   : > { %v429_v12 = vpop.permute.xlu0 %428 }
  0xbb   : > { %765 = vmatmul.mubr.msk.f32.vlgmr.msra.gmra.mrb[0].mxu0 %vm430_vm5, %v429_v12 }
  0xcb   : > { %v514_v15 = vpop.permute.xlu0 %513 }
  0xcc   : > { %v522_v16 = vmul.f32 %v747_v13, %v514_v15 }
  0xce   : > { %v530_v17 = vadd.f32 %v748_v14, %v522_v16 }
  0xd0   : > { %819 = vtanh.f32 %v530_v17 }
  0xda   : > { %v820_v23 = vpop.eup %819 }
  0xdb   : > { %v624_v24 = vadd.f32 %v820_v23, %v621_v22 }
  0xdd   : > { %628 = vst.msk [vmem:[%s416_s16] sm:$0xff] %vm627_vm6, %v624_v24 }
 0x11d   : > { %v616_v19 = vpop.f32.mrb[0].mxu1 }
 0x11e   : > { %v617_v20 = vadd.f32 %v749_v18, %v616_v19  ;;  %v773_v21 = vpop.f32.mrb[1].mxu1 }
 0x120   : > { %821 = vtanh.f32 %v617_v20 }
 0x12a   : > { %v822_v26 = vpop.eup %821 }
 0x12b   : > { %v626_v27 = vadd.f32 %v822_v26, %v623_v25 }
 0x12d   : > { %630 = vst.msk [vmem:[%s416_s16 + $0x10] sm:$0xff] %vm627_vm6, %v626_v27 }
 0x18e   : > { %v499_v29 = vpop.f32.mrb[0].mxu0 }
 0x18f   : > { %v500_v30 = vadd.f32 %v745_v28, %v499_v29  ;;  %v766_v31 = vpop.f32.mrb[1].mxu0 }
 0x191   : > { %823 = vtanh.f32 %v500_v30 }
 0x19b   : > { %v824_v32 = vpop.eup %823 }
 0x19c   : > { %505 = vrot.lane.b32.xlu1 %v824_v32, %s905_s23 }
 0x20e   : > { %v506_v34 = vpop.permute.xlu1 %505 }
 0x20f   : > { %v508_v35 = vsel %vm430_vm5, %v417_v3, %v506_v34 }
 0x210   : > { %v625_v36 = vadd.f32 %v622_v33, %v508_v35 }
 0x212   : > { %629 = vst.msk [vmem:[%s416_s16 + $0x8] sm:$0xff] %vm627_vm6, %v625_v36 }
 0x213 PF: > { %s22_s13 = sadd.s32 1, %s895_s13  }
 0x214   : > { %p19_p5 = scmp.ge.s32.totalorder %s22_s13, 4  }
 0x216   :  { %21 = sbr.rel (!%p19_p5) target bundleno = 2 (0x2), region = 105 }
 0x21d   :  { %652 = vsyncpa [#allocation3], 1 }
 0x21e   :  { %654 = vsyncpa [#allocation3 + $0x1], 1 }
 0x21f   :  { %655 = vsyncpa [#allocation5], 1 }

// kernel: action_inference_forward.3
= control target key start
LH: loop header
LB: loop body
LE: loop exit
PB: predicated region body
PF: predicated region fallthrough
CT: control target
= control target key end

     0   :  { %s4912_s0 = inlined_call_operand.vmem [shape: f32[2,24,32], index: 0, kind: input, shape index: {}]   ;;  %s4913_s1 = inlined_call_operand.vmem [shape: f32[24,24], index: 1, kind: input, shape index: {}]   ;;  %s4914_s2 = inlined_call_operand.vmem [shape: f32[2,1,32], index: 2, kind: input, shape index: {}]   ;;  %s4915_s3 = inlined_call_operand.vmem [shape: f32[2,1,32], index: 3, kind: input, shape index: {}]   ;;  %s4916_s4 = inlined_call_operand.vmem [shape: f32[2,32,32], index: 4, kind: input, shape index: {}]   ;;  %s4917_s5 = inlined_call_operand.vmem [shape: f32[2,1,32], index: 5, kind: input, shape index: {}]   ;;  %s4918_s6 = inlined_call_operand.vmem [shape: f32[2,32,32], index: 6, kind: input, shape index: {}]   ;;  %s4919_s7 = inlined_call_operand.vmem [shape: f32[2,1,32], index: 7, kind: input, shape index: {}]   ;;  %s4920_s8 = inlined_call_operand.vmem [shape: f32[2,32,32], index: 8, kind: input, shape index: {}]   ;;  %s4921_s9 = inlined_call_operand.vmem [shape: f32[2,1,32], index: 9, kind: input, shape index: {}]   ;;  %s4922_s10 = inlined_call_operand.vmem [shape: f32[2,32,32], index: 10, kind: input, shape index: {}]   ;;  %s4923_s11 = inlined_call_operand.vmem [shape: f32[2,1,32], index: 11, kind: input, shape index: {}]   ;;  %s4924_s12 = inlined_call_operand.vmem [shape: f32[2,1,32], index: 12, kind: input, shape index: {}]   ;;  %s4925_s13 = inlined_call_operand.vmem [shape: f32[2,1,32], index: 13, kind: input, shape index: {}]   ;;  %s4926_s14 = inlined_call_operand.vmem [shape: f32[2,32,128], index: 14, kind: input, shape index: {}]   ;;  %s4927_s15 = inlined_call_operand.vmem [shape: f32[2,1,128], index: 15, kind: input, shape index: {}]   ;;  %s4928_s16 = inlined_call_operand.vmem [shape: f32[2,128,32], index: 16, kind: input, shape index: {}]   ;;  %s4929_s17 = inlined_call_operand.vmem [shape: f32[2,1,32], index: 17, kind: input, shape index: {}]   ;;  %s4930_s18 = inlined_call_operand.vmem [shape: f32[1,32], index: 18, kind: input, shape index: {}]   ;;  %s4931_s19 = inlined_call_operand.vmem [shape: f32[1,32], index: 19, kind: input, shape index: {}]   ;;  %s4932_s20 = inlined_call_operand.hbm [shape: f32[2,8,32], index: 20, kind: output, shape index: {}]  }
   0x1   :  { %4949 = sst [smem:[#allocation19_spill]] %s4912_s0 }
   0x2   :  { %4950 = sst [smem:[#allocation20_spill]] %s4913_s1 }
   0x3   :  { %4951 = sst [smem:[#allocation21_spill]] %s4914_s2 }
   0x4   :  { %4952 = sst [smem:[#allocation22_spill]] %s4915_s3 }
   0x5   :  { %4953 = sst [smem:[#allocation23_spill]] %s4916_s4 }
   0x6   :  { %4954 = sst [smem:[#allocation24_spill]] %s4917_s5 }
   0x7   :  { %4955 = sst [smem:[#allocation25_spill]] %s4918_s6 }
   0x8   :  { %4956 = sst [smem:[#allocation26_spill]] %s4920_s8 }
   0x9   :  { %4957 = sst [smem:[#allocation27_spill]] %s4922_s10 }
   0xa   :  { %4958 = sst [smem:[#allocation28_spill]] %s4923_s11 }
   0xb   :  { %4959 = sst [smem:[#allocation29_spill]] %s4924_s12 }
   0xc   :  { %4960 = sst [smem:[#allocation30_spill]] %s4928_s16 }
   0xd   :  { %4961 = sst [smem:[#allocation31_spill]] %s4929_s17 }
   0xe   :  { %4962 = sst [smem:[#allocation32_spill]] %s4930_s18 }
   0xf   :  { %4963 = sst [smem:[#allocation33_spill]] %s4931_s19 }
  0x10   :  { %4964 = sst [smem:[#allocation34_spill]] %s4932_s20 }
  0x11   :  { %25 = vsyncpa [#allocation4], 0 }
  0x12   :  { %27 = vsyncpa [#allocation4 + $0x1], 0  ;;  %s4157_s1 = smov 0   ;;  %s4159_s22 = smov 0  }
  0x13   :  { %s4161_s23 = smov 0   ;;  %s4163_s24 = smov 0  }
  0x14   :  { %s4165_s2 = smov 0   ;;  %s4167_s25 = smov 0  }
  0x15   :  { %s4169_s3 = smov 0   ;;  %s4171_s26 = smov 0  }
  0x16 LB: > { %4965 = sst [smem:[#allocation6_spill]] %s4014_s1  ;;  %s3195_s27 = sadd.s32 4294967295, %s4042_s26   ;;  %s4042_s26 = sphi %s4171_s26, %s33_s26   ;;  %s4038_s3 = sphi %s4169_s3, %s5027_s3   ;;  %s4034_s25 = sphi %s4167_s25, %s5026_s25   ;;  %s4030_s2 = sphi %s4165_s2, %s5025_s2   ;;  %s4026_s24 = sphi %s4163_s24, %s5024_s24   ;;  %s4022_s23 = sphi %s4161_s23, %s5023_s23   ;;  %s4018_s22 = sphi %s4159_s22, %s5022_s22   ;;  %s4014_s1 = sphi %s4157_s1, %s5021_s1  }
  0x17   : > { %4966 = sst [smem:[#allocation7_spill]] %s4018_s22  ;;  %s3196_s28 = sadd.s32 4294967294, %s4042_s26  }
  0x18   : > { %4967 = sst [smem:[#allocation8_spill]] %s4022_s23  ;;  %s42_s4 = sadd.s32 1, %s4034_s25 }
  0x19   : > { %4968 = sst [smem:[#allocation9_spill]] %s4026_s24  ;;  %p43_p0 = scmp.ge.s32.totalorder %s42_s4, 2 }
  0x1a   : > { %4969 = sst [smem:[#allocation10_spill]] %s4030_s2  ;;  %s45_s29 = sadd.s32 1, %s4038_s3 }
  0x1b   : > { %4970 = sst [smem:[#allocation11_spill]] %s4034_s25  ;;  %p567_p1 = scmp.ne.s32.totalorder %s4022_s23, %s4018_s22 }
  0x1c   : > { %4971 = sst [smem:[#allocation12_spill]] %s4038_s3  ;;  %p568_p2 = scmp.eq.s32.totalorder %s3195_s27, 3 }
  0x1d   : > { %4972 = sst [smem:[#allocation13_spill]] %s4042_s26  ;;  %s5029_s4 = smov (%p43_p0, %s42_s4), 0 }
  0x1e   : > { %4973 = sst [smem:[#allocation14_spill]] %s5029_s4  ;;  %s5031_s29 = smov (!%p43_p0, %s45_s29), %s4038_s3 }
  0x1f   : > { %p4206_p3 = por %p568_p2, %p567_p1  ;;  %p573_p4 = scmp.ne.s32.totalorder %s4018_s22, %s4014_s1 }
  0x20   : > { %p47_p5 = scmp.ge.s32.totalorder %s5031_s29, 2  ;;  %p574_p6 = scmp.eq.s32.totalorder %s3196_s28, 3 }
  0x21   : > { %s4974_s30 = scalar_select %p4206_p3, 1, 0 }
  0x22   : > { %p3199_p7 = scmp.ge.s32.totalorder %s4042_s26, 1  ;;  %p717_p8 = scmp.lt.s32.totalorder %s4042_s26, 5 }
  0x23   : > { %4975 = sst [smem:[#allocation15_spill]] %s4974_s30  ;;  %s5033_s29 = smov (%p47_p5, %s5031_s29), 0 }
  0x24   : > { %4976 = sst [smem:[#allocation16_spill]] %s5033_s29  ;;  %p4216_p9 = por %p574_p6, %p573_p4 }
  0x25   : > { %p718_p10 = pnand %p3199_p7, %p717_p8  ;;  %s554_s21 = ssub.s32 %s4038_s3, %s5033_s29 }
  0x26   : > { %s4977_s0 = scalar_select %p4216_p9, 1, 0 }
  0x27   : > { %s557_s27 = sadd.s32 1, %s4022_s23  ;;  %p555_p11 = scmp.eq.s32.totalorder %s554_s21, 0 }
  0x28   : > { %4978 = sst [smem:[#allocation17_spill]] %s4977_s0  ;;  %721 = sbr.rel (%p718_p10) target bundleno = 2862 (0xb2e), region = 100 }
  0x29   : > { %s4224_s4 = scalar_select %p555_p11, %s4022_s23, %s557_s27  }
  0x2a   : > { %s4939_s28 = sand.u32 (!%p718_p10), 1, %s4018_s22   ;;  %p835_p12 = scmp.lt.s32.totalorder (!%p718_p10), %s4030_s2, 1 }
  0x2b   : > { %4979 = sst [smem:[#allocation18_spill]] %s4224_s4  ;;  %s4230_s25 = sshll.u32 (!%p718_p10), %s4939_s28, 3 }
  0x2c   : > { %p840_p13 = scmp.lt.s32.totalorder (!%p718_p10), %s4026_s24, 1  ;;  %s4983_s17 = sld [smem:[#allocation23_spill]] (!%p718_p10) }
  0x2d   : > { %s4985_s6 = sld [smem:[#allocation25_spill]] (!%p718_p10)  ;;  %s4986_s8 = sld [smem:[#allocation26_spill]] (!%p718_p10) }
  0x2e   : > { %s4987_s10 = sld [smem:[#allocation27_spill]] (!%p718_p10)  ;;  %s834_s30 = scalar_lea.vmem (!%p718_p10), [#allocation3], %s4230_s25 }
  0x2f   : > { %s836_s0 = scalar_select %p835_p12, %s4030_s2, 1 }
  0x30   : > { %s4235_s1 = scalar_select %p840_p13, %s4026_s24, 1 }
  0x31   : > { %s3762_s21 = smul.u32 24, %s836_s0  ;;  %s4982_s2 = sld [smem:[#allocation19_spill]] }
  0x32   : > { %s3292_s18 = sshll.u32 %s4235_s1, 5  ;;  %s891_s20 = scalar_lea.vmem %s4927_s15, %s4235_s1 }
  0x33   : > { %s4252_s0 = scalar_lea.vmem %s4983_s17, %s3292_s18  ;;  %s4261_s26 = scalar_lea.vmem %s4985_s6, %s3292_s18 }
  0x34   : > { %s4270_s16 = scalar_lea.vmem %s4986_s8, %s3292_s18  ;;  %s4279_s3 = scalar_lea.vmem %s4987_s10, %s3292_s18 }
  0x35   : > { %s883_s8 = scalar_lea.vmem %s4925_s13, %s4235_s1  ;;  %s4296_s24 = scalar_lea.vmem %s4926_s14, %s3292_s18 }
  0x36   : > { %s3297_s10 = sshll.u32 %s4235_s1, 7  ;;  %s4990_s6 = sld [smem:[#allocation31_spill]] }
  0x37   : > { %s839_s19 = scalar_lea.vmem %s4982_s2, %s3762_s21  ;;  %s4991_s2 = sld [smem:[#allocation30_spill]] }
  0x38   : > { %s4992_s21 = sld [smem:[#allocation9_spill]] }
  0x3c   : > { %s899_s11 = scalar_lea.vmem %s4990_s6, %s4235_s1 }
  0x3d   : > { %s4310_s12 = scalar_lea.vmem %s4991_s2, %s3297_s10 }
  0x3e   : > { %p3214_p0 = scmp.ne.s32.totalorder %s4992_s21, 0 }
  0x3f   : > { %v904_v0 = vld [vmem:[%s839_s19] sm:$0xff] (!%p3214_p0)  ;;  %vm907_vm0 = vcmask (!%p3214_p0), 261120   ;;  %v905_v1 = vld [vmem:[%s839_s19 + $0x8] sm:$0xff] (!%p3214_p0)  ;;  %v906_v2 = vld [vmem:[%s839_s19 + $0x10] sm:$0xff] (!%p3214_p0) }
  0x40   : > { %903 = sbr.rel (%p3214_p0) target bundleno = 71 (0x47), region = 104  ;;  %908 = vst.msk [vmem:[#allocation2] sm:$0xff] (!%p3214_p0), %vm907_vm0, %v904_v0  ;;  %909 = vst.msk [vmem:[#allocation2 + $0x8] sm:$0xff] (!%p3214_p0), %vm907_vm0, %v905_v1 }
  0x41   : > { %910 = vst.msk [vmem:[#allocation2 + $0x10] sm:$0xff] (!%p3214_p0), %vm907_vm0, %v906_v2 }
  0x47 PF: > { %v911_v3 = vld [vmem:[#allocation2] sm:$0xff]  ;;  %vm916_vm1 = vcmask 261120   ;;  %v912_v5 = vld [vmem:[#allocation2 + $0x8] sm:$0xff]  ;;  %v4044_v27 = vmov 0.0|0.0   ;;  %v977_v30 = vld [vmem:[%s4252_s0 + $0x10] sm:$0xff]  ;;  %vm4045_vm2 = vmmov 0   ;;  %s4997_s29 = scalar_lea.vmem %s4921_s9, %s4235_s1  ;;  %s4998_s23 = scalar_lea.vmem %s4919_s7, %s4235_s1 }
  0x48   : > { %v913_v4 = vld [vmem:[#allocation2 + $0x10] sm:$0xff]  ;;  %v917_v6 = vsel %vm916_vm1, %v911_v3, 0.0  ;;  %v920_v8 = vsel %vm916_vm1, %v912_v5, 0.0  ;;  %v975_v24 = vld [vmem:[%s4252_s0] sm:$0xff]  ;;  %v976_v25 = vld [vmem:[%s4252_s0 + $0x8] sm:$0xff]  ;;  %3682 = vmatprep.subr.bf16.mxu1 %v4044_v27  ;;  %3694 = vmatprep.subr.bf16.mxu0 %v4044_v27  ;;  %v4046_v35 = vmov 0.0  }
  0x49   : > { %v923_v7 = vsel %vm916_vm1, %v913_v4, 0.0  ;;  %918 = vadd.xlane.f32.xlu0 %v917_v6  ;;  %v1166_v26 = vld [vmem:[%s4270_s16] sm:$0xff]  ;;  %v3683_v28 = vpack.c.bf16 %v976_v25, %v975_v24  ;;  %v1167_v29 = vld [vmem:[%s4270_s16 + $0x8] sm:$0xff]  ;;  %v978_v31 = vld [vmem:[%s4252_s0 + $0x18] sm:$0xff]  ;;  %3417 = vmatprep.mubr.msk.f32.mxu1 %vm4045_vm2, %v4046_v35  ;;  %s4993_s10 = sld [smem:[#allocation21_spill]]  ;;  %s4995_s2 = sld [smem:[#allocation22_spill]] }
  0x4a   : > { %924 = vadd.xlane.f32.xlu1 %v923_v7  ;;  %v3695_v32 = vpack.c.bf16 %v1167_v29, %v1166_v26  ;;  %v1168_v33 = vld [vmem:[%s4270_s16 + $0x10] sm:$0xff]  ;;  %v1169_v34 = vld [vmem:[%s4270_s16 + $0x18] sm:$0xff]  ;;  %3451 = vmatprep.mubr.msk.f32.mxu0 %vm4045_vm2, %v4046_v35  ;;  %v3686_v36 = vpack.c.bf16 %v978_v31, %v977_v30  ;;  %v1075_v50 = vld [vmem:[%s4261_s26] sm:$0xff]  ;;  %vm1332_vm3 = vcmask 64512   ;;  %s4047_s4 = smov 112   ;;  %s4048_s22 = smov 120  }
  0x4b   : > { %3684 = vmatpush3.bf16.msra.mxu1 %v3683_v28  ;;  %v3698_v37 = vpack.c.bf16 %v1169_v34, %v1168_v33  ;;  %v1076_v51 = vld [vmem:[%s4261_s26 + $0x8] sm:$0xff]  ;;  %v1077_v60 = vld [vmem:[%s4261_s26 + $0x10] sm:$0xff]  ;;  %v1078_v61 = vld [vmem:[%s4261_s26 + $0x18] sm:$0xff]  ;;  %s5001_s6 = sld [smem:[#allocation24_spill]]  ;;  %vm1701_vm5 = vcmask 195584  }
  0x4c   : > { %3696 = vmatpush3.bf16.msra.mxu0 %v3695_v32  ;;  %3685 = vmatprep.subr.bf16.mxu1 %v4044_v27  ;;  %v3689_v55 = vpack.c.bf16 %v1076_v51, %v1075_v50  ;;  %v3692_v1 = vpack.c.bf16 %v1078_v61, %v1077_v60  ;;  %v4391_v7 = vld [vmem:[%s4997_s29] ss:$0 sm:$0xff]  ;;  %vm4414_vm4 = vmpackc.low %vm1332_vm3, %vm1332_vm3 }
  0x4d   : > { %921 = vadd.xlane.f32.xlu0 %v920_v8  ;;  %3697 = vmatprep.subr.bf16.mxu0 %v4044_v27 }
  0x4f   : > { %3687 = vmatpush3.bf16.msra.mxu1 %v3686_v36  ;;  %s4994_s18 = scalar_lea.vmem %s4993_s10, %s4235_s1  ;;  %s4996_s16 = scalar_lea.vmem %s4995_s2, %s4235_s1 }
  0x50   : > { %3699 = vmatpush3.bf16.msra.mxu0 %v3698_v37  ;;  %3688 = vmatprep.subr.bf16.mxu1 %v4044_v27  ;;  %v3215_v48 = vld [vmem:[%s4994_s18] ss:$0 sm:$0xff]  ;;  %s4049_s18 = smov 104   ;;  %s5003_s2 = sld [smem:[#allocation20_spill]] }
  0x51   : > { %3704 = vmatprep.subr.bf16.mxu0 %v4044_v27  ;;  %v3216_v52 = vld [vmem:[%s4996_s16] ss:$0 sm:$0xff]  ;;  %s5002_s10 = scalar_lea.vmem %s5001_s6, %s4235_s1 }
  0x52   : > { %v3217_v34 = vld [vmem:[%s5002_s10] ss:$0 sm:$0xff] }
  0x56   : > { %s5004_s16 = smov %s5003_s2 }
  0xd6   : > { %v919_v9 = vpop.xlane.xlu0 %918 }
  0xd7   : > { %v925_v10 = vpop.xlane.xlu1 %924  ;;  %v927_v11 = vmul.f32 0.03125, %v919_v9 }
  0xd8   : > { %v929_v12 = vmul.f32 0.03125, %v925_v10 }
  0xd9   : > { %v930_v13 = vsub.f32 %v911_v3, %v927_v11 }
  0xda   : > { %v4317_v14 = vsub.f32 %v913_v4, %v929_v12  ;;  %v922_v15 = vpop.xlane.xlu0 %921 }
  0xdb   : > { %v928_v16 = vmul.f32 0.03125, %v922_v15  ;;  %v933_v17 = vmul.f32 %v930_v13, %v930_v13 }
  0xdc   : > { %v935_v18 = vmul.f32 %v4317_v14, %v4317_v14 }
  0xdd   : > { %v931_v19 = vsub.f32 %v912_v5, %v928_v16  ;;  %v936_v20 = vsel %vm916_vm1, %v933_v17, 0.0 }
  0xde   : > { %937 = vadd.xlane.f32.xlu1 %v936_v20  ;;  %v942_v21 = vsel %vm916_vm1, %v935_v18, 0.0 }
  0xdf   : > { %v934_v22 = vmul.f32 %v931_v19, %v931_v19 }
  0xe1   : > { %v939_v23 = vsel %vm916_vm1, %v934_v22, 0.0  ;;  %v3221_v22 = vld [vmem:[%s4998_s23] ss:$0 sm:$0xff]  ;;  %s5005_s23 = sld [smem:[#allocation28_spill]] }
  0xe2   : > { %943 = vadd.xlane.f32.xlu1 %v942_v21  ;;  %940 = vadd.xlane.f32.xlu0 %v939_v23 }
 0x16b   : > { %v938_v38 = vpop.xlane.xlu1 %937 }
 0x16c   : > { %v945_v39 = vmul.f32 0.03125, %v938_v38 }
 0x16e   : > { %v948_v40 = vadd.f32 1e-05, %v945_v39 }
 0x16f   : > { %v944_v41 = vpop.xlane.xlu1 %943  ;;  %v941_v42 = vpop.xlane.xlu0 %940 }
 0x170   : > { %3871 = vrsqrt.f32 %v948_v40  ;;  %v947_v43 = vmul.f32 0.03125, %v944_v41  ;;  %v946_v44 = vmul.f32 0.03125, %v941_v42 }
 0x172   : > { %v950_v45 = vadd.f32 1e-05, %v947_v43  ;;  %v949_v46 = vadd.f32 1e-05, %v946_v44 }
 0x174   : > { %3873 = vrsqrt.f32 %v950_v45 }
 0x175   : > { %3875 = vrsqrt.f32 %v949_v46 }
 0x17a   : > { %v3872_v47 = vpop.eup %3871 }
 0x17b   : > { %v954_v49 = vmul.f32 %v3872_v47, %v930_v13 }
 0x17d   : > { %v963_v53 = vmul.f32 %v3215_v48, %v954_v49 }
 0x17e   : > { %v3874_v54 = vpop.eup %3873 }
 0x17f   : > { %v3876_v56 = vpop.eup %3875  ;;  %v972_v57 = vadd.f32 %v3216_v52, %v963_v53  ;;  %v956_v59 = vmul.f32 %v3874_v54, %v4317_v14 }
 0x180   : > { %v955_v58 = vmul.f32 %v3876_v56, %v931_v19 }
 0x181   : > { %3418 = vmatmul.mubr.msk.f32.vlgmr.msra.gmra.mrb[0].mxu1 %vm916_vm1, %v972_v57  ;;  %3452 = vmatmul.mubr.msk.f32.vlgmr.msra.gmra.mrb[0].mxu0 %vm916_vm1, %v972_v57  ;;  %v965_v0 = vmul.f32 %v3215_v48, %v956_v59 }
 0x182   : > { %3420 = vmatprep.mubr.msk.f32.mxu1 %vm4045_vm2, %v4046_v35  ;;  %3690 = vmatpush3.bf16.msra.mxu1 %v3689_v55  ;;  %v964_v62 = vmul.f32 %v3215_v48, %v955_v58 }
 0x183   : > { %3454 = vmatprep.mubr.msk.f32.mxu0 %vm4045_vm2, %v4046_v35  ;;  %3691 = vmatprep.subr.bf16.mxu1 %v4044_v27  ;;  %v974_v2 = vadd.f32 %v3216_v52, %v965_v0  ;;  %v1329_v0 = vld [vmem:[%s5003_s2] sm:$0xff] }
 0x184   : > { %v973_v63 = vadd.f32 %v3216_v52, %v964_v62 }
 0x186   : > { %3421 = vmatmul.mubr.msk.f32.gmra.mrb[2].mxu1 %vm916_vm1, %v973_v63  ;;  %3455 = vmatmul.mubr.msk.f32.gmra.mrb[2].mxu0 %vm916_vm1, %v973_v63 }
 0x187   : > { %3423 = vmatprep.mubr.msk.f32.mxu1 %vm4045_vm2, %v4046_v35  ;;  %3457 = vmatprep.mubr.msk.f32.mxu0 %vm4045_vm2, %v4046_v35 }
 0x188   : > { %3693 = vmatpush3.bf16.msra.mxu1 %v3692_v1 }
 0x189   : > { %3700 = vmatprep.subr.bf16.mxu1 %v4044_v27 }
 0x18a   : > { %3424 = vmatmul.mubr.msk.f32.gmra.mrb[4].mxu1 %vm916_vm1, %v974_v2  ;;  %3458 = vmatmul.mubr.msk.f32.gmra.mrb[4].mxu0 %vm916_vm1, %v974_v2 }
 0x18b   : > { %3434 = vmatprep.mubr.msk.f32.mxu1 %vm4045_vm2, %v4046_v35  ;;  %3481 = vmatprep.mubr.msk.f32.mxu0 %vm4045_vm2, %v4046_v35 }
 0x18e   : > { %3435 = vmatmul.mubr.msk.f32.vlgmr.msra.gmra.mrb[6].mxu1 %vm916_vm1, %v972_v57 }
 0x18f   : > { %3437 = vmatprep.mubr.msk.f32.mxu1 %vm4045_vm2, %v4046_v35 }
 0x192   : > { %3438 = vmatmul.mubr.msk.f32.gmra.mrb[8].mxu1 %vm916_vm1, %v973_v63 }
 0x193   : > { %3440 = vmatprep.mubr.msk.f32.mxu1 %vm4045_vm2, %v4046_v35 }
 0x196   : > { %3441 = vmatmul.mubr.msk.f32.gmra.mrb[10].mxu1 %vm916_vm1, %v974_v2 }
 0x197   : > { %3466 = vmatprep.mubr.msk.f32.mxu1 %vm4045_vm2, %v4046_v35 }
 0x254   : > { %v1061_v3 = vpop.f32.mrb[0].mxu1  ;;  %v1243_v4 = vpop.f32.mrb[0].mxu0 }
 0x255   : > { %v3419_v5 = vpop.f32.mrb[1].mxu1  ;;  %v3453_v6 = vpop.f32.mrb[1].mxu0  ;;  %v4394_v10 = vadd.f32 %v4391_v7, %v1243_v4  ;;  %v1062_v36 = vadd.f32 %v3217_v34, %v1061_v3  ;;  %v1330_v4 = vld [vmem:[%s5004_s16 + $0x8] sm:$0xff] }
 0x259   : > { %v1066_v8 = vpop.f32.mrb[2].mxu1  ;;  %v1248_v9 = vpop.f32.mrb[2].mxu0 }
 0x25a   : > { %v4397_v11 = vadd.f32 %v4391_v7, %v1248_v9  ;;  %v3422_v12 = vpop.f32.mrb[3].mxu1  ;;  %v3456_v13 = vpop.f32.mrb[3].mxu0  ;;  %v1067_v37 = vadd.f32 %v3217_v34, %v1066_v8  ;;  %v1331_v9 = vld [vmem:[%s5004_s16 + $0x10] sm:$0xff] }
 0x25c   : > { %v3717_v14 = vpack.c.bf16 %v4397_v11, %v4394_v10  ;;  %v4403_v15 = vpack.i.bf16 %v4397_v11, %v4394_v10 }
 0x25d   : > { %v1071_v16 = vpop.f32.mrb[4].mxu1  ;;  %v4405_v17 = vpop.f32.mrb[4].mxu0 }
 0x25e   : > { %v3425_v18 = vpop.f32.mrb[5].mxu1  ;;  %v3459_v19 = vpop.f32.mrb[5].mxu0  ;;  %v1072_v38 = vadd.f32 %v3217_v34, %v1071_v16  ;;  %v4475_v58 = vadd.f32 %v4391_v7, %v4405_v17 }
 0x261   : > { %v1152_v20 = vpop.f32.mrb[6].mxu1 }
 0x262   : > { %v3436_v21 = vpop.f32.mrb[7].mxu1  ;;  %v1153_v24 = vadd.f32 %v3221_v22, %v1152_v20 }
 0x265   : > { %v1157_v23 = vpop.f32.mrb[8].mxu1 }
 0x266   : > { %v1158_v25 = vadd.f32 %v3221_v22, %v1157_v23  ;;  %v3439_v26 = vpop.f32.mrb[9].mxu1 }
 0x268   : > { %v3701_v28 = vpack.c.bf16 %v1158_v25, %v1153_v24  ;;  %v3846_v29 = vpack.i.bf16 %v1158_v25, %v1153_v24 }
 0x269   : > { %v1162_v31 = vpop.f32.mrb[10].mxu1 }
 0x26a   : > { %3847 = vrot.lane.b32.xlu1 %v3846_v29, %s4047_s4  ;;  %3842 = vrot.lane.b32.xlu0 %v3846_v29, %s4048_s22  ;;  %v3442_v32 = vpop.f32.mrb[11].mxu1  ;;  %v1163_v33 = vadd.f32 %v3221_v22, %v1162_v31 }
 0x26b   : > { %3703 = vmatpush3.bf16.xpose.msk.msra.mxu1 %vm4414_vm4, %v3701_v28 }
 0x26c   : > { %3464 = vmatprep.subr.mxu1 %v4046_v35 }
 0x26e   : > { %3852 = vrot.lane.b32.xlu0 %v3846_v29, %s4049_s18  ;;  %1285 = vrot.lane.b32.xlu1 %v1163_v33, %s4048_s22 }
 0x272   : > { %1291 = vrot.lane.b32.xlu0 %v1163_v33, %s4047_s4  ;;  %1260 = vrot.lane.b32.xlu1 %v1062_v36, %s4048_s22 }
 0x273   : > { %3465 = vmatpush3.xpose.msk.msra.mxu1 %vm1332_vm3, %v1163_v33 }
 0x274   : > { %3708 = vmatprep.subr.bf16.mxu1 %v4044_v27 }
 0x276   : > { %3467 = vmatmul.mubr.msk.f32.vlgmr.msra.gmra.mrb[12].mxu1 %vm1332_vm3, %v1062_v36  ;;  %1266 = vrot.lane.b32.xlu0 %v1062_v36, %s4047_s4 }
 0x277   : > { %1262 = vrot.lane.b32.xlu1 %v1067_v37, %s4048_s22  ;;  %3469 = vmatprep.mubr.msk.f32.mxu1 %vm4045_vm2, %v4046_v35 }
 0x27a   : > { %3470 = vmatmul.mubr.msk.f32.gmra.mrb[14].mxu1 %vm1332_vm3, %v1067_v37  ;;  %1268 = vrot.lane.b32.xlu0 %v1067_v37, %s4047_s4 }
 0x27b   : > { %1264 = vrot.lane.b32.xlu1 %v1072_v38, %s4048_s22  ;;  %3472 = vmatprep.mubr.msk.f32.mxu1 %vm4045_vm2, %v4046_v35 }
 0x27e   : > { %3473 = vmatmul.mubr.msk.f32.gmra.mrb[16].mxu1 %vm1332_vm3, %v1072_v38  ;;  %1270 = vrot.lane.b32.xlu0 %v1072_v38, %s4047_s4 }
 0x27f   : > { %1297 = vrot.lane.b32.xlu1 %v1163_v33, %s4049_s18  ;;  %3496 = vmatprep.mubr.msk.f32.mxu1 %vm4045_vm2, %v4046_v35 }
 0x282   : > { %1276 = vrot.lane.b32.xlu0 %v1072_v38, %s4049_s18 }
 0x283   : > { %1272 = vrot.lane.b32.xlu1 %v1062_v36, %s4049_s18 }
 0x287   : > { %1274 = vrot.lane.b32.xlu1 %v1067_v37, %s4049_s18 }
 0x2dc   : > { %v3848_v39 = vpop.permute.xlu1 %3847  ;;  %v3843_v40 = vpop.permute.xlu0 %3842 }
 0x2dd   : > { %v3850_v41 = vunpack.i.h.bf16 %v3848_v39  ;;  %v3849_v42 = vunpack.i.l.bf16 %v3848_v39  ;;  %v3845_v43 = vunpack.i.h.bf16 %v3843_v40  ;;  %v3844_v44 = vunpack.i.l.bf16 %v3843_v40 }
 0x2df   : > { %v3709_v45 = vpack.c.bf16 %v3850_v41, %v3849_v42  ;;  %v3705_v46 = vpack.c.bf16 %v3845_v43, %v3844_v44 }
 0x2e0   : > { %v3853_v47 = vpop.permute.xlu0 %3852  ;;  %v1286_v48 = vpop.permute.xlu1 %1285 }
 0x2e1   : > { %3707 = vmatpush3.bf16.xpose.msk.msra.mxu0 %vm4414_vm4, %v3705_v46  ;;  %3711 = vmatpush3.bf16.xpose.msk.msra.mxu1 %vm4414_vm4, %v3709_v45  ;;  %v3855_v51 = vunpack.i.h.bf16 %v3853_v47  ;;  %v3854_v52 = vunpack.i.l.bf16 %v3853_v47 }
 0x2e2   : > { %3479 = vmatprep.subr.mxu0 %v4046_v35  ;;  %3494 = vmatprep.subr.mxu1 %v4046_v35 }
 0x2e3   : > { %v3713_v55 = vpack.c.bf16 %v3855_v51, %v3854_v52 }
 0x2e4   : > { %v1292_v49 = vpop.permute.xlu0 %1291  ;;  %v1261_v50 = vpop.permute.xlu1 %1260 }
 0x2e8   : > { %v1267_v53 = vpop.permute.xlu0 %1266 }
 0x2e9   : > { %v1263_v54 = vpop.permute.xlu1 %1262  ;;  %3480 = vmatpush3.xpose.msk.msra.mxu0 %vm1332_vm3, %v1286_v48  ;;  %3495 = vmatpush3.xpose.msk.msra.mxu1 %vm1332_vm3, %v1292_v49 }
 0x2ea   : > { %3712 = vmatprep.subr.bf16.mxu0 %v4044_v27  ;;  %3716 = vmatprep.subr.bf16.mxu1 %v4044_v27 }
 0x2ec   : > { %3482 = vmatmul.mubr.msk.f32.vlgmr.msra.gmra.mrb[6].mxu0 %vm1332_vm3, %v1261_v50  ;;  %3497 = vmatmul.mubr.msk.f32.vlgmr.msra.gmra.mrb[18].mxu1 %vm1332_vm3, %v1267_v53  ;;  %v1269_v56 = vpop.permute.xlu0 %1268 }
 0x2ed   : > { %v1265_v57 = vpop.permute.xlu1 %1264  ;;  %3715 = vmatpush3.bf16.xpose.msk.msra.mxu0 %vm4414_vm4, %v3713_v55  ;;  %3718 = vmatpush3.bf16.msra.mxu1 %v3717_v14 }
 0x2ee   : > { %3484 = vmatprep.mubr.msk.f32.mxu0 %vm4045_vm2, %v4046_v35  ;;  %3499 = vmatprep.mubr.msk.f32.mxu1 %vm4045_vm2, %v4046_v35 }
 0x2ef   : > { %3524 = vmatprep.subr.mxu1 %v4046_v35  ;;  %3509 = vmatprep.subr.mxu0 %v4046_v35 }
 0x2f0   : > { %3485 = vmatmul.mubr.msk.f32.gmra.mrb[8].mxu0 %vm1332_vm3, %v1263_v54  ;;  %3500 = vmatmul.mubr.msk.f32.gmra.mrb[20].mxu1 %vm1332_vm3, %v1269_v56  ;;  %v1271_v60 = vpop.permute.xlu0 %1270 }
 0x2f1   : > { %v1298_v59 = vpop.permute.xlu1 %1297  ;;  %3525 = vmatpush3.msra.mxu1 %v4475_v58  ;;  %3487 = vmatprep.mubr.msk.f32.mxu0 %vm4045_vm2, %v4046_v35 }
 0x2f2   : > { %3502 = vmatprep.mubr.msk.f32.mxu1 %vm4045_vm2, %v4046_v35  ;;  %3722 = vmatprep.subr.bf16.mxu1 %v4044_v27 }
 0x2f4   : > { %3488 = vmatmul.mubr.msk.f32.gmra.mrb[10].mxu0 %vm1332_vm3, %v1265_v57  ;;  %3503 = vmatmul.mubr.msk.f32.gmra.mrb[22].mxu1 %vm1332_vm3, %v1271_v60  ;;  %v1277_v63 = vpop.permute.xlu0 %1276 }
 0x2f5   : > { %v1273_v61 = vpop.permute.xlu1 %1272  ;;  %3510 = vmatpush3.xpose.msk.msra.mxu0 %vm1332_vm3, %v1298_v59  ;;  %3511 = vmatprep.mubr.msk.f32.mxu0 %vm4045_vm2, %v4046_v35 }
 0x2f6   : > { %3719 = vmatprep.subr.bf16.mxu0 %v4044_v27  ;;  %3526 = vmatprep.mubr.msk.f32.mxu1 %vm4045_vm2, %v4046_v35 }
 0x2f8   : > { %3512 = vmatmul.mubr.msk.f32.vlgmr.msra.gmra.mrb[12].mxu0 %vm1332_vm3, %v1273_v61 }
 0x2f9   : > { %3514 = vmatprep.mubr.msk.f32.mxu0 %vm4045_vm2, %v4046_v35  ;;  %v1275_v62 = vpop.permute.xlu1 %1274 }
 0x2fc   : > { %3515 = vmatmul.mubr.msk.f32.gmra.mrb[14].mxu0 %vm1332_vm3, %v1275_v62 }
 0x2fd   : > { %3517 = vmatprep.mubr.msk.f32.mxu0 %vm4045_vm2, %v4046_v35 }
 0x300   : > { %3518 = vmatmul.mubr.msk.f32.gmra.mrb[16].mxu0 %vm1332_vm3, %v1277_v63 }
 0x301   : > { %3541 = vmatprep.mubr.msk.f32.mxu0 %vm4045_vm2, %v4046_v35 }
 0x349   : > { %v1411_v1 = vpop.f32.mrb[12].mxu1 }
 0x34a   : > { %v4507_v2 = vadd.f32 %v1411_v1, %v1329_v0  ;;  %v3468_v3 = vpop.f32.mrb[13].mxu1 }
 0x34c   : > { %v1702_v5 = vsel %vm1701_vm5, %v4507_v2, -inf }
 0x34d   : > { %1703 = vmax.xlane.f32.xlu1 %v1702_v5  ;;  %v1416_v6 = vpop.f32.mrb[14].mxu1 }
 0x34e   : > { %v4514_v7 = vadd.f32 %v1416_v6, %v1330_v4  ;;  %v3471_v8 = vpop.f32.mrb[15].mxu1 }
 0x350   : > { %v1705_v10 = vsel %vm1701_vm5, %v4514_v7, -inf }
 0x351   : > { %1706 = vmax.xlane.f32.xlu0 %v1705_v10  ;;  %v1421_v11 = vpop.f32.mrb[16].mxu1 }
 0x352   : > { %v4521_v12 = vadd.f32 %v1421_v11, %v1331_v9  ;;  %v3474_v13 = vpop.f32.mrb[17].mxu1 }
 0x354   : > { %v1708_v14 = vsel %vm1701_vm5, %v4521_v12, -inf }
 0x355   : > { %1709 = vmax.xlane.f32.xlu1 %v1708_v14 }
 0x3bf   : > { %v1503_v16 = vpop.f32.mrb[6].mxu0  ;;  %v1595_v17 = vpop.f32.mrb[18].mxu1 }
 0x3c0   : > { %v4525_v18 = vadd.f32 %v1503_v16, %v1329_v0  ;;  %v4527_v19 = vadd.f32 %v1595_v17, %v1329_v0  ;;  %v3483_v20 = vpop.f32.mrb[7].mxu0  ;;  %v3498_v21 = vpop.f32.mrb[19].mxu1 }
 0x3c2   : > { %v1711_v22 = vsel %vm1701_vm5, %v4525_v18, -inf  ;;  %v1720_v23 = vsel %vm1701_vm5, %v4527_v19, -inf }
 0x3c3   : > { %v1508_v24 = vpop.f32.mrb[8].mxu0  ;;  %1712 = vmax.xlane.f32.xlu0 %v1711_v22  ;;  %1721 = vmax.xlane.f32.xlu1 %v1720_v23  ;;  %v1600_v25 = vpop.f32.mrb[20].mxu1 }
 0x3c4   : > { %v4533_v26 = vadd.f32 %v1508_v24, %v1330_v4  ;;  %v3486_v28 = vpop.f32.mrb[9].mxu0  ;;  %v3501_v29 = vpop.f32.mrb[21].mxu1  ;;  %v4539_v37 = vadd.f32 %v1600_v25, %v1330_v4 }
 0x3c6   : > { %v1714_v30 = vsel %vm1701_vm5, %v4533_v26, -inf  ;;  %v1723_v44 = vsel %vm1701_vm5, %v4539_v37, -inf }
 0x3c7   : > { %v1513_v31 = vpop.f32.mrb[10].mxu0  ;;  %1715 = vmax.xlane.f32.xlu0 %v1714_v30  ;;  %v1605_v32 = vpop.f32.mrb[22].mxu1 }
 0x3c8   : > { %v4537_v33 = vadd.f32 %v1513_v31, %v1331_v9  ;;  %v3489_v34 = vpop.f32.mrb[11].mxu0  ;;  %v3504_v36 = vpop.f32.mrb[23].mxu1  ;;  %v4545_v42 = vadd.f32 %v1605_v32, %v1331_v9 }
 0x3ca   : > { %v1717_v38 = vsel %vm1701_vm5, %v4537_v33, -inf  ;;  %v1726_v49 = vsel %vm1701_vm5, %v4545_v42, -inf }
 0x3cb   : > { %v1687_v39 = vpop.f32.mrb[12].mxu0  ;;  %1718 = vmax.xlane.f32.xlu0 %v1717_v38 }
 0x3cc   : > { %v4543_v40 = vadd.f32 %v1687_v39, %v1329_v0  ;;  %v3513_v41 = vpop.f32.mrb[13].mxu0 }
 0x3ce   : > { %v1729_v43 = vsel %vm1701_vm5, %v4543_v40, -inf }
 0x3cf   : > { %v1692_v45 = vpop.f32.mrb[14].mxu0  ;;  %1730 = vmax.xlane.f32.xlu1 %v1729_v43  ;;  %1724 = vmax.xlane.f32.xlu0 %v1723_v44 }
 0x3d0   : > { %v4551_v46 = vadd.f32 %v1692_v45, %v1330_v4  ;;  %v3516_v47 = vpop.f32.mrb[15].mxu0 }
 0x3d2   : > { %v1732_v48 = vsel %vm1701_vm5, %v4551_v46, -inf }
 0x3d3   : > { %v1697_v50 = vpop.f32.mrb[16].mxu0  ;;  %1733 = vmax.xlane.f32.xlu1 %v1732_v48  ;;  %1727 = vmax.xlane.f32.xlu0 %v1726_v49 }
 0x3d4   : > { %v4557_v51 = vadd.f32 %v1697_v50, %v1331_v9  ;;  %v3519_v52 = vpop.f32.mrb[17].mxu0 }
 0x3d6   : > { %v1735_v53 = vsel %vm1701_vm5, %v4557_v51, -inf }
 0x3d7   : > { %1736 = vmax.xlane.f32.xlu0 %v1735_v53 }
 0x3da   : > { %v1704_v54 = vpop.xlane.xlu1 %1703 }
 0x3db   : > { %v1738_v55 = vsub.f32 %v4507_v2, %v1704_v54 }
 0x3dd   : > { %v1750_v57 = vmul.f32 1.442695, %v1738_v55 }
 0x3de   : > { %v1707_v56 = vpop.xlane.xlu0 %1706 }
 0x3df   : > { %v1739_v59 = vsub.f32 %v4514_v7, %v1707_v56  ;;  %3877 = vpow2.f32 %v1750_v57 }
 0x3e1   : > { %v1752_v61 = vmul.f32 1.442695, %v1739_v59 }
 0x3e2   : > { %v1710_v60 = vpop.xlane.xlu1 %1709 }
 0x3e3   : > { %v1740_v62 = vsub.f32 %v4521_v12, %v1710_v60  ;;  %3879 = vpow2.f32 %v1752_v61 }
 0x3e4   : > { %1306 = vrot.lane.b32.xlu1 %v4475_v58, %s4048_s22 }
 0x3e5   : > { %v1754_v63 = vmul.f32 1.442695, %v1740_v62 }
 0x3e7   : > { %3881 = vpow2.f32 %v1754_v63 }
 0x3e8   : > { %3862 = vrot.lane.b32.xlu1 %v4403_v15, %s4047_s4 }
 0x3e9   : > { %v4572_v0 = vpop.eup %3877 }
 0x3ed   : > { %3857 = vrot.lane.b32.xlu0 %v4403_v15, %s4048_s22  ;;  %v4576_v1 = vpop.eup %3879 }
 0x3ee   : > { %v1777_v2 = vsel %vm1701_vm5, %v4576_v1, 0.0 }
 0x3f1   : > { %3867 = vrot.lane.b32.xlu0 %v4403_v15, %s4049_s18  ;;  %v1774_v15 = vsel %vm1701_vm5, %v4572_v0, 0.0  ;;  %v4580_v3 = vpop.eup %3881 }
 0x3f2   : > { %v1780_v4 = vsel %vm1701_vm5, %v4580_v3, 0.0 }
 0x40c   : > { %1775 = vadd.xlane.f32.xlu1 %v1774_v15 }
 0x410   : > { %1778 = vadd.xlane.f32.xlu1 %v1777_v2 }
 0x414   : > { %1781 = vadd.xlane.f32.xlu1 %v1780_v4 }
 0x450   : > { %v1713_v5 = vpop.xlane.xlu0 %1712  ;;  %v1722_v6 = vpop.xlane.xlu1 %1721 }
 0x451   : > { %v1741_v7 = vsub.f32 %v4525_v18, %v1713_v5  ;;  %v1744_v8 = vsub.f32 %v4527_v19, %v1722_v6 }
 0x453   : > { %v1756_v9 = vmul.f32 1.442695, %v1741_v7  ;;  %v1762_v10 = vmul.f32 1.442695, %v1744_v8 }
 0x454   : > { %v1716_v11 = vpop.xlane.xlu0 %1715 }
 0x455   : > { %3883 = vpow2.f32 %v1756_v9  ;;  %v1742_v12 = vsub.f32 %v4533_v26, %v1716_v11 }
 0x456   : > { %3885 = vpow2.f32 %v1762_v10 }
 0x457   : > { %v1758_v13 = vmul.f32 1.442695, %v1742_v12 }
 0x458   : > { %v1719_v14 = vpop.xlane.xlu0 %1718 }
 0x459   : > { %3887 = vpow2.f32 %v1758_v13  ;;  %v1743_v16 = vsub.f32 %v4537_v33, %v1719_v14 }
 0x45b   : > { %v1760_v25 = vmul.f32 1.442695, %v1743_v16 }
 0x45c   : > { %v1731_v17 = vpop.xlane.xlu1 %1730  ;;  %v1725_v20 = vpop.xlane.xlu0 %1724 }
 0x45d   : > { %v1747_v21 = vsub.f32 %v4543_v40, %v1731_v17  ;;  %v1745_v18 = vsub.f32 %v4539_v37, %v1725_v20 }
 0x45f   : > { %v4590_v22 = vpop.eup %3883  ;;  %v1768_v19 = vmul.f32 1.442695, %v1747_v21  ;;  %v1764_v23 = vmul.f32 1.442695, %v1745_v18 }
 0x460   : > { %v4592_v24 = vpop.eup %3885  ;;  %v1734_v26 = vpop.xlane.xlu1 %1733  ;;  %v1783_v29 = vsel %vm1701_vm5, %v4590_v22, 0.0 }
 0x461   : > { %v1728_v28 = vpop.xlane.xlu0 %1727  ;;  %3889 = vpow2.f32 %v1768_v19  ;;  %v1748_v30 = vsub.f32 %v4551_v46, %v1734_v26  ;;  %v1792_v32 = vsel %vm1701_vm5, %v4592_v24, 0.0  ;;  %1784 = vadd.xlane.f32.xlu0 %v1783_v29 }
 0x462   : > { %v1746_v31 = vsub.f32 %v4545_v42, %v1728_v28  ;;  %3891 = vpow2.f32 %v1764_v23  ;;  %1793 = vadd.xlane.f32.xlu1 %v1792_v32 }
 0x463   : > { %v4600_v33 = vpop.eup %3887  ;;  %v1770_v34 = vmul.f32 1.442695, %v1748_v30  ;;  %3893 = vpow2.f32 %v1760_v25 }
 0x464   : > { %v1766_v36 = vmul.f32 1.442695, %v1746_v31  ;;  %v1786_v38 = vsel %vm1701_vm5, %v4600_v33, 0.0  ;;  %v1307_v52 = vpop.permute.xlu1 %1306 }
 0x465   : > { %v1737_v37 = vpop.xlane.xlu0 %1736  ;;  %3895 = vpow2.f32 %v1770_v34  ;;  %1787 = vadd.xlane.f32.xlu0 %v1786_v38 }
 0x466   : > { %v1749_v39 = vsub.f32 %v4557_v51, %v1737_v37  ;;  %3897 = vpow2.f32 %v1766_v36 }
 0x468   : > { %v1772_v40 = vmul.f32 1.442695, %v1749_v39  ;;  %v3863_v59 = vpop.permute.xlu1 %3862 }
 0x469   : > { %v3858_v41 = vpop.permute.xlu0 %3857  ;;  %v3865_v63 = vunpack.i.h.bf16 %v3863_v59  ;;  %v3864_v15 = vunpack.i.l.bf16 %v3863_v59 }
 0x46a   : > { %3899 = vpow2.f32 %v1772_v40  ;;  %v3860_v42 = vunpack.i.h.bf16 %v3858_v41  ;;  %v3859_v43 = vunpack.i.l.bf16 %v3858_v41  ;;  %v2190_v40 = vld [vmem:[%s4279_s3] sm:$0xff] }
 0x46b   : > { %v4605_v44 = vpop.eup %3889  ;;  %v3723_v5 = vpack.c.bf16 %v3865_v63, %v3864_v15 }
 0x46c   : > { %v4607_v45 = vpop.eup %3891  ;;  %v3720_v46 = vpack.c.bf16 %v3860_v42, %v3859_v43  ;;  %v1801_v47 = vsel %vm1701_vm5, %v4605_v44, 0.0  ;;  %v2191_v43 = vld [vmem:[%s4279_s3 + $0x8] sm:$0xff] }
 0x46d   : > { %1802 = vadd.xlane.f32.xlu1 %v1801_v47  ;;  %v1795_v48 = vsel %vm1701_vm5, %v4607_v45, 0.0  ;;  %v4613_v49 = vpop.eup %3893  ;;  %v3868_v8 = vpop.permute.xlu0 %3867 }
 0x46e   : > { %1796 = vadd.xlane.f32.xlu0 %v1795_v48  ;;  %3721 = vmatpush3.bf16.msra.mxu0 %v3720_v46  ;;  %v1789_v53 = vsel %vm1701_vm5, %v4613_v49, 0.0  ;;  %v3870_v11 = vunpack.i.h.bf16 %v3868_v8  ;;  %v3869_v12 = vunpack.i.l.bf16 %v3868_v8 }
 0x46f   : > { %v4615_v50 = vpop.eup %3895  ;;  %3539 = vmatprep.subr.mxu0 %v4046_v35 }
 0x470   : > { %v1804_v51 = vsel %vm1701_vm5, %v4615_v50, 0.0  ;;  %v4622_v54 = vpop.eup %3897  ;;  %v3726_v17 = vpack.c.bf16 %v3870_v11, %v3869_v12 }
 0x471   : > { %1805 = vadd.xlane.f32.xlu1 %v1804_v51  ;;  %v1798_v57 = vsel %vm1701_vm5, %v4622_v54, 0.0  ;;  %v2192_v51 = vld [vmem:[%s4279_s3 + $0x10] sm:$0xff] }
 0x472   : > { %1790 = vadd.xlane.f32.xlu0 %v1789_v53  ;;  %3540 = vmatpush3.msra.mxu0 %v1307_v52 }
 0x473   : > { %3725 = vmatprep.subr.bf16.mxu0 %v4044_v27 }
 0x474   : > { %v4624_v55 = vpop.eup %3899 }
 0x475   : > { %v1807_v56 = vsel %vm1701_vm5, %v4624_v55, 0.0 }
 0x476   : > { %1808 = vadd.xlane.f32.xlu1 %v1807_v56  ;;  %1799 = vadd.xlane.f32.xlu0 %v1798_v57 }
 0x487   : > { %1315 = vrot.lane.b32.xlu1 %v4475_v58, %s4047_s4  ;;  %s5006_s4 = scalar_lea.vmem %s5005_s23, %s4235_s1 }
 0x48c   : > { %1324 = vrot.lane.b32.xlu0 %v4475_v58, %s4049_s18 }
 0x499   : > { %v1776_v60 = vpop.xlane.xlu1 %1775 }
 0x49a   : > { %3901 = vrcp.f32 %v1776_v60 }
 0x49d   : > { %v1779_v61 = vpop.xlane.xlu1 %1778 }
 0x49e   : > { %3903 = vrcp.f32 %v1779_v61 }
 0x4a1   : > { %v1782_v62 = vpop.xlane.xlu1 %1781 }
 0x4a2   : > { %3905 = vrcp.f32 %v1782_v62 }
 0x4a4   : > { %v3902_v2 = vpop.eup %3901 }
 0x4a5   : > { %v1822_v4 = vmul.f32 %v3902_v2, %v4572_v0 }
 0x4a7   : > { %3527 = vmatmul.mubr.msk.f32.vlgmr.msra.gmra.mrb[24].mxu1 %vm1701_vm5, %v1822_v4 }
 0x4a8   : > { %v3904_v6 = vpop.eup %3903  ;;  %3724 = vmatpush3.bf16.msra.mxu1 %v3723_v5  ;;  %3529 = vmatprep.mubr.msk.f32.mxu1 %vm4045_vm2, %v4046_v35 }
 0x4a9   : > { %v1823_v58 = vmul.f32 %v3904_v6, %v4576_v1  ;;  %3554 = vmatprep.subr.mxu1 %v4046_v35 }
 0x4ab   : > { %3530 = vmatmul.mubr.msk.f32.gmra.mrb[26].mxu1 %vm1701_vm5, %v1823_v58 }
 0x4ac   : > { %v3906_v7 = vpop.eup %3905  ;;  %3532 = vmatprep.mubr.msk.f32.mxu1 %vm4045_vm2, %v4046_v35 }
 0x4ad   : > { %v1824_v0 = vmul.f32 %v3906_v7, %v4580_v3 }
 0x4af   : > { %3533 = vmatmul.mubr.msk.f32.gmra.mrb[28].mxu1 %vm1701_vm5, %v1824_v0 }
 0x4b0   : > { %3556 = vmatprep.mubr.msk.f32.mxu1 %vm4045_vm2, %v4046_v35 }
 0x4ee   : > { %v1785_v9 = vpop.xlane.xlu0 %1784 }
 0x4ef   : > { %3907 = vrcp.f32 %v1785_v9  ;;  %v1794_v1 = vpop.xlane.xlu1 %1793 }
 0x4f2   : > { %v1788_v10 = vpop.xlane.xlu0 %1787 }
 0x4f3   : > { %3909 = vrcp.f32 %v1788_v10 }
 0x4f4   : > { %3911 = vrcp.f32 %v1794_v1 }
 0x4f9   : > { %v3908_v13 = vpop.eup %3907 }
 0x4fa   : > { %v1825_v14 = vmul.f32 %v3908_v13, %v4590_v22  ;;  %v1803_v16 = vpop.xlane.xlu1 %1802 }
 0x4fb   : > { %v1797_v3 = vpop.xlane.xlu0 %1796 }
 0x4fc   : > { %3542 = vmatmul.mubr.msk.f32.vlgmr.msra.gmra.mrb[18].mxu0 %vm1701_vm5, %v1825_v14  ;;  %3913 = vrcp.f32 %v1797_v3 }
 0x4fd   : > { %v3910_v20 = vpop.eup %3909  ;;  %3727 = vmatpush3.bf16.msra.mxu0 %v3726_v17  ;;  %3544 = vmatprep.mubr.msk.f32.mxu0 %vm4045_vm2, %v4046_v35 }
 0x4fe   : > { %v1806_v21 = vpop.xlane.xlu1 %1805  ;;  %v1826_v18 = vmul.f32 %v3910_v20, %v4600_v33  ;;  %3569 = vmatprep.subr.mxu0 %v4046_v35  ;;  %v3912_v23 = vpop.eup %3911 }
 0x4ff   : > { %v1791_v19 = vpop.xlane.xlu0 %1790  ;;  %v1828_v26 = vmul.f32 %v3912_v23, %v4592_v24 }
 0x500   : > { %3915 = vrcp.f32 %v1791_v19  ;;  %3545 = vmatmul.mubr.msk.f32.gmra.mrb[20].mxu0 %vm1701_vm5, %v1826_v18 }
 0x501   : > { %3547 = vmatprep.mubr.msk.f32.mxu0 %vm4045_vm2, %v4046_v35  ;;  %3917 = vrcp.f32 %v1803_v16 }
 0x503   : > { %v1809_v22 = vpop.xlane.xlu1 %1808  ;;  %v1800_v25 = vpop.xlane.xlu0 %1799 }
 0x504   : > { %3919 = vrcp.f32 %v1800_v25 }
 0x505   : > { %3921 = vrcp.f32 %v1806_v21 }
 0x506   : > { %3923 = vrcp.f32 %v1809_v22  ;;  %v3914_v29 = vpop.eup %3913 }
 0x507   : > { %v1316_v28 = vpop.permute.xlu1 %1315  ;;  %v1325_v30 = vpop.permute.xlu0 %1324  ;;  %v1829_v32 = vmul.f32 %v3914_v29, %v4607_v45  ;;  %v3277_v29 = vld [vmem:[%s5006_s4] ss:$0 sm:$0xff] }
 0x508   : > { %3555 = vmatpush3.msra.mxu1 %v1316_v28  ;;  %3570 = vmatpush3.msra.mxu0 %v1325_v30 }
 0x509   : > { %3557 = vmatmul.mubr.msk.f32.vlgmr.msra.gmra.mrb[30].mxu1 %vm1701_vm5, %v1828_v26  ;;  %3758 = vmatprep.subr.bf16.mxu1 %v4044_v27 }
 0x50a   : > { %3559 = vmatprep.mubr.msk.f32.mxu1 %vm4045_vm2, %v4046_v35  ;;  %v3916_v31 = vpop.eup %3915  ;;  %3760 = vmatpush3.bf16.msra.mxu1 %v3726_v17 }
 0x50b   : > { %3591 = vmatprep.subr.mxu0 %v4046_v35  ;;  %v1827_v24 = vmul.f32 %v3916_v31, %v4613_v49  ;;  %3759 = vmatprep.subr.mxu1 %v4046_v35  ;;  %v3918_v33 = vpop.eup %3917 }
 0x50c   : > { %v1831_v37 = vmul.f32 %v3918_v33, %v4605_v44  ;;  %v2193_v44 = vld [vmem:[%s4279_s3 + $0x18] sm:$0xff] }
 0x50d   : > { %3560 = vmatmul.mubr.msk.f32.gmra.mrb[32].mxu1 %vm1701_vm5, %v1829_v32  ;;  %3548 = vmatmul.mubr.msk.f32.gmra.mrb[22].mxu0 %vm1701_vm5, %v1827_v24  ;;  %v3943_v32 = vld [vmem:[#allocation2] sm:$0xff] }
 0x50e   : > { %3562 = vmatprep.mubr.msk.f32.mxu1 %vm4045_vm2, %v4046_v35  ;;  %v3920_v34 = vpop.eup %3919  ;;  %3761 = vmatpush3.msra.mxu1 %v1325_v30 }
 0x50f   : > { %3571 = vmatprep.mubr.msk.f32.mxu0 %vm4045_vm2, %v4046_v35  ;;  %v3922_v36 = vpop.eup %3921  ;;  %v1830_v38 = vmul.f32 %v3920_v34, %v4622_v54  ;;  %3580 = vmatprep.subr.mxu1 %v4046_v35 }
 0x510   : > { %v3924_v39 = vpop.eup %3923  ;;  %v1832_v42 = vmul.f32 %v3922_v36, %v4615_v50 }
 0x511   : > { %3563 = vmatmul.mubr.msk.f32.gmra.mrb[34].mxu1 %vm1701_vm5, %v1830_v38  ;;  %3572 = vmatmul.mubr.msk.f32.vlgmr.msra.gmra.mrb[24].mxu0 %vm1701_vm5, %v1831_v37  ;;  %v1833_v41 = vmul.f32 %v3924_v39, %v4624_v55 }
 0x512   : > { %3574 = vmatprep.mubr.msk.f32.mxu0 %vm4045_vm2, %v4046_v35  ;;  %3577 = vmatprep.mubr.msk.f32.mxu1 %vm4045_vm2, %v4046_v35 }
 0x513   : > { %3592 = vmatpush3.msra.mxu0 %v2190_v40 }
 0x514   : > { %3613 = vmatprep.subr.mxu0 %v4046_v35 }
 0x515   : > { %3575 = vmatmul.mubr.msk.f32.gmra.mrb[26].mxu0 %vm1701_vm5, %v1832_v42  ;;  %3578 = vmatmul.mubr.msk.f32.vlgmr.msra.gmra.mrb[36].mxu1 %vm1701_vm5, %v1833_v41  ;;  %v3944_v41 = vld [vmem:[#allocation2 + $0x8] sm:$0xff] }
 0x516   : > { %3593 = vmatprep.mubr.msk.f32.mxu0 %vm4045_vm2, %v4046_v35  ;;  %3582 = vmatprep.mubr.msk.f32.mxu1 %vm4045_vm2, %v4046_v35 }
 0x517   : > { %3581 = vmatpush3.msra.mxu1 %v2191_v43 }
 0x518   : > { %3602 = vmatprep.subr.mxu1 %v4046_v35 }
 0x57a   : > { %v1909_v45 = vpop.f32.mrb[24].mxu1 }
 0x57b   : > { %v3528_v46 = vpop.f32.mrb[25].mxu1  ;;  %3594 = vmatmul.mubr.msk.f32.vlgmr.msra.gmra.mrb[28].mxu0 %vm1332_vm3, %v1909_v45 }
 0x57c   : > { %3596 = vmatprep.mubr.msk.f32.mxu0 %vm4045_vm2, %v4046_v35  ;;  %3614 = vmatpush3.msra.mxu0 %v2193_v44 }
 0x57d   : > { %3734 = vmatprep.subr.bf16.mxu0 %v4044_v27 }
 0x57e   : > { %v1914_v47 = vpop.f32.mrb[26].mxu1 }
 0x57f   : > { %v3531_v48 = vpop.f32.mrb[27].mxu1  ;;  %3597 = vmatmul.mubr.msk.f32.gmra.mrb[30].mxu0 %vm1332_vm3, %v1914_v47 }
 0x580   : > { %3599 = vmatprep.mubr.msk.f32.mxu0 %vm4045_vm2, %v4046_v35 }
 0x582   : > { %v1919_v49 = vpop.f32.mrb[28].mxu1 }
 0x583   : > { %v3534_v50 = vpop.f32.mrb[29].mxu1  ;;  %3600 = vmatmul.mubr.msk.f32.gmra.mrb[32].mxu0 %vm1332_vm3, %v1919_v49  ;;  %v3945_v49 = vld [vmem:[#allocation2 + $0x10] sm:$0xff] }
 0x584   : > { %3615 = vmatprep.mubr.msk.f32.mxu0 %vm4045_vm2, %v4046_v35 }
 0x5cf   : > { %v1998_v52 = vpop.f32.mrb[18].mxu0 }
 0x5d0   : > { %v3543_v53 = vpop.f32.mrb[19].mxu0  ;;  %3583 = vmatmul.mubr.msk.f32.vlgmr.msra.gmra.mrb[38].mxu1 %vm1332_vm3, %v1998_v52 }
 0x5d1   : > { %3585 = vmatprep.mubr.msk.f32.mxu1 %vm4045_vm2, %v4046_v35  ;;  %3603 = vmatpush3.msra.mxu1 %v2192_v51 }
 0x5d2   : > { %3728 = vmatprep.subr.bf16.mxu1 %v4044_v27 }
 0x5d3   : > { %v2003_v54 = vpop.f32.mrb[20].mxu0 }
 0x5d4   : > { %v3546_v55 = vpop.f32.mrb[21].mxu0  ;;  %3586 = vmatmul.mubr.msk.f32.gmra.mrb[40].mxu1 %vm1332_vm3, %v2003_v54 }
 0x5d5   : > { %3588 = vmatprep.mubr.msk.f32.mxu1 %vm4045_vm2, %v4046_v35 }
 0x5dc   : > { %v2087_v56 = vpop.f32.mrb[30].mxu1 }
 0x5dd   : > { %v3558_v57 = vpop.f32.mrb[31].mxu1 }
 0x5e0   : > { %v2092_v59 = vpop.f32.mrb[32].mxu1  ;;  %v2008_v60 = vpop.f32.mrb[22].mxu0 }
 0x5e1   : > { %v3561_v61 = vpop.f32.mrb[33].mxu1  ;;  %v3549_v62 = vpop.f32.mrb[23].mxu0  ;;  %3589 = vmatmul.mubr.msk.f32.gmra.mrb[42].mxu1 %vm1332_vm3, %v2008_v60 }
 0x5e2   : > { %3604 = vmatprep.mubr.msk.f32.mxu1 %vm4045_vm2, %v4046_v35 }
 0x5e4   : > { %v2097_v63 = vpop.f32.mrb[34].mxu1  ;;  %v2176_v15 = vpop.f32.mrb[24].mxu0 }
 0x5e5   : > { %v3564_v2 = vpop.f32.mrb[35].mxu1  ;;  %v3573_v4 = vpop.f32.mrb[25].mxu0  ;;  %3605 = vmatmul.mubr.msk.f32.vlgmr.msra.gmra.mrb[44].mxu1 %vm1332_vm3, %v2087_v56  ;;  %3616 = vmatmul.mubr.msk.f32.vlgmr.msra.gmra.mrb[34].mxu0 %vm1332_vm3, %v2176_v15 }
 0x5e6   : > { %3607 = vmatprep.mubr.msk.f32.mxu1 %vm4045_vm2, %v4046_v35  ;;  %3618 = vmatprep.mubr.msk.f32.mxu0 %vm4045_vm2, %v4046_v35 }
 0x5e8   : > { %v2181_v5 = vpop.f32.mrb[26].mxu0  ;;  %v2186_v6 = vpop.f32.mrb[36].mxu1 }
 0x5e9   : > { %v3576_v58 = vpop.f32.mrb[27].mxu0  ;;  %v3579_v7 = vpop.f32.mrb[37].mxu1  ;;  %3608 = vmatmul.mubr.msk.f32.gmra.mrb[46].mxu1 %vm1332_vm3, %v2092_v59  ;;  %3619 = vmatmul.mubr.msk.f32.gmra.mrb[36].mxu0 %vm1332_vm3, %v2181_v5 }
 0x5ea   : > { %3610 = vmatprep.mubr.msk.f32.mxu1 %vm4045_vm2, %v4046_v35  ;;  %3621 = vmatprep.mubr.msk.f32.mxu0 %vm4045_vm2, %v4046_v35  ;;  %v2628_v7 = vld [vmem:[%s4296_s24] sm:$0xff] }
 0x5ed   : > { %3611 = vmatmul.mubr.msk.f32.gmra.mrb[48].mxu1 %vm1332_vm3, %v2097_v63  ;;  %3622 = vmatmul.mubr.msk.f32.gmra.mrb[38].mxu0 %vm1332_vm3, %v2186_v6 }
 0x5ee   : > { %3632 = vmatprep.mubr.msk.f32.mxu1 %vm4045_vm2, %v4046_v35  ;;  %3673 = vmatprep.mubr.msk.f32.mxu0 %vm4045_vm2, %v4046_v35 }
 0x64e   : > { %v2358_v0 = vpop.f32.mrb[28].mxu0 }
 0x64f   : > { %v3595_v8 = vpop.f32.mrb[29].mxu0 }
 0x652   : > { %v2363_v9 = vpop.f32.mrb[30].mxu0 }
 0x653   : > { %v3598_v10 = vpop.f32.mrb[31].mxu0 }
 0x654   : > { %v2631_v10 = vld [vmem:[%s4296_s24 + $0x18] sm:$0xff] }
 0x656   : > { %v2368_v1 = vpop.f32.mrb[32].mxu0 }
 0x657   : > { %v3601_v11 = vpop.f32.mrb[33].mxu0 }
 0x6a3   : > { %v2269_v12 = vpop.f32.mrb[38].mxu1 }
 0x6a4   : > { %v2359_v13 = vadd.f32 %v2358_v0, %v2269_v12  ;;  %v3584_v14 = vpop.f32.mrb[39].mxu1  ;;  %v2629_v0 = vld [vmem:[%s4296_s24 + $0x8] sm:$0xff] }
 0x6a5   : > { %v3729_v8 = vpack.c.bf16 %v2629_v0, %v2628_v7 }
 0x6a7   : > { %v2274_v16 = vpop.f32.mrb[40].mxu1  ;;  %3730 = vmatpush3.bf16.msra.mxu1 %v3729_v8 }
 0x6a8   : > { %v2364_v17 = vadd.f32 %v2363_v9, %v2274_v16  ;;  %v3587_v3 = vpop.f32.mrb[41].mxu1  ;;  %3731 = vmatprep.subr.bf16.mxu1 %v4044_v27  ;;  %v2630_v9 = vld [vmem:[%s4296_s24 + $0x10] sm:$0xff]  ;;  %s5007_s24 = sld [smem:[#allocation29_spill]] }
 0x6ae   : > { %s5008_s5 = scalar_lea.vmem %s5007_s24, %s4235_s1 }
 0x6b4   : > { %v2279_v20 = vpop.f32.mrb[42].mxu1 }
 0x6b5   : > { %v2369_v21 = vadd.f32 %v2368_v1, %v2279_v20  ;;  %v3590_v18 = vpop.f32.mrb[43].mxu1  ;;  %v3732_v1 = vpack.c.bf16 %v2631_v10, %v2630_v9 }
 0x6b7   : > { %3733 = vmatpush3.bf16.msra.mxu1 %v3732_v1 }
 0x6b8   : > { %v2447_v19 = vpop.f32.mrb[44].mxu1  ;;  %v2539_v22 = vpop.f32.mrb[34].mxu0 }
 0x6b9   : > { %v2461_v23 = vadd.f32 %v2447_v19, %v2359_v13  ;;  %v3606_v25 = vpop.f32.mrb[45].mxu1  ;;  %v3617_v26 = vpop.f32.mrb[35].mxu0  ;;  %v3278_v19 = vld [vmem:[%s5008_s5] ss:$0 sm:$0xff] }
 0x6bb   : > { %v2553_v28 = vadd.f32 %v2539_v22, %v2461_v23  ;;  %v3279_v23 = vld [vmem:[%s883_s8] ss:$0 sm:$0xff] }
 0x6bc   : > { %v2452_v30 = vpop.f32.mrb[46].mxu1  ;;  %v2544_v31 = vpop.f32.mrb[36].mxu0 }
 0x6bd   : > { %v2556_v24 = vadd.f32 %v3943_v32, %v2553_v28  ;;  %v2462_v33 = vadd.f32 %v2452_v30, %v2364_v17  ;;  %v3609_v34 = vpop.f32.mrb[47].mxu1  ;;  %v3620_v36 = vpop.f32.mrb[37].mxu0 }
 0x6be   : > { %v2806_v36 = vld [vmem:[%s4310_s12] sm:$0xff] }
 0x6bf   : > { %v4738_v37 = vadd.f32 %v3277_v29, %v2556_v24  ;;  %v2554_v38 = vadd.f32 %v2544_v31, %v2462_v33 }
 0x6c0   : > { %v2457_v39 = vpop.f32.mrb[48].mxu1  ;;  %v2549_v40 = vpop.f32.mrb[38].mxu0 }
 0x6c1   : > { %v2557_v42 = vadd.f32 %v3944_v41, %v2554_v38  ;;  %v2463_v43 = vadd.f32 %v2457_v39, %v2369_v21  ;;  %v3612_v44 = vpop.f32.mrb[49].mxu1  ;;  %v3623_v45 = vpop.f32.mrb[39].mxu0  ;;  %v2571_v46 = vsel %vm916_vm1, %v4738_v37, 0.0  ;;  %v2807_v38 = vld [vmem:[%s4310_s12 + $0x8] sm:$0xff]  ;;  %v2809_v41 = vld [vmem:[%s4310_s12 + $0x18] sm:$0xff] }
 0x6c2   : > { %2572 = vadd.xlane.f32.xlu1 %v2571_v46  ;;  %v3735_v39 = vpack.c.bf16 %v2807_v38, %v2806_v36  ;;  %v2811_v44 = vld [vmem:[%s4310_s12 + $0x28] sm:$0xff]  ;;  %v2812_v46 = vld [vmem:[%s4310_s12 + $0x30] sm:$0xff] }
 0x6c3   : > { %v4742_v47 = vadd.f32 %v3277_v29, %v2557_v42  ;;  %v2555_v48 = vadd.f32 %v2549_v40, %v2463_v43  ;;  %v2808_v40 = vld [vmem:[%s4310_s12 + $0x10] sm:$0xff]  ;;  %v2810_v43 = vld [vmem:[%s4310_s12 + $0x20] sm:$0xff] }
 0x6c4   : > { %3736 = vmatpush3.bf16.msra.mxu0 %v3735_v39  ;;  %v3738_v42 = vpack.c.bf16 %v2809_v41, %v2808_v40  ;;  %v3741_v45 = vpack.c.bf16 %v2811_v44, %v2810_v43 }
 0x6c5   : > { %v2558_v50 = vadd.f32 %v3945_v49, %v2555_v48  ;;  %v2574_v51 = vsel %vm916_vm1, %v4742_v47, 0.0  ;;  %3737 = vmatprep.subr.bf16.mxu0 %v4044_v27  ;;  %v2813_v48 = vld [vmem:[%s4310_s12 + $0x38] sm:$0xff] }
 0x6c6   : > { %2575 = vadd.xlane.f32.xlu0 %v2574_v51  ;;  %v3744_v49 = vpack.c.bf16 %v2813_v48, %v2812_v46  ;;  %v2815_v51 = vld [vmem:[%s4310_s12 + $0x48] sm:$0xff] }
 0x6c7   : > { %v4746_v52 = vadd.f32 %v3277_v29, %v2558_v50  ;;  %v2814_v50 = vld [vmem:[%s4310_s12 + $0x40] sm:$0xff] }
 0x6c8   : > { %3739 = vmatpush3.bf16.msra.mxu0 %v3738_v42 }
 0x6c9   : > { %v2577_v53 = vsel %vm916_vm1, %v4746_v52, 0.0  ;;  %3740 = vmatprep.subr.bf16.mxu0 %v4044_v27 }
 0x6ca   : > { %2578 = vadd.xlane.f32.xlu0 %v2577_v53  ;;  %v3747_v53 = vpack.c.bf16 %v2815_v51, %v2814_v50 }
 0x6cc   : > { %3742 = vmatpush3.bf16.msra.mxu0 %v3741_v45 }
 0x6cd   : > { %3743 = vmatprep.subr.bf16.mxu0 %v4044_v27 }
 0x6d0   : > { %3745 = vmatpush3.bf16.msra.mxu0 %v3744_v49 }
 0x6d1   : > { %3746 = vmatprep.subr.bf16.mxu0 %v4044_v27 }
 0x6d4   : > { %3748 = vmatpush3.bf16.msra.mxu0 %v3747_v53 }
 0x6d5   : > { %3749 = vmatprep.subr.bf16.mxu0 %v4044_v27 }
 0x74f   : > { %v2573_v54 = vpop.xlane.xlu1 %2572 }
 0x750   : > { %v2580_v55 = vmul.f32 0.03125, %v2573_v54  ;;  %v2816_v54 = vld [vmem:[%s4310_s12 + $0x50] sm:$0xff] }
 0x752   : > { %v2583_v56 = vsub.f32 %v4738_v37, %v2580_v55  ;;  %v2817_v55 = vld [vmem:[%s4310_s12 + $0x58] sm:$0xff] }
 0x753   : > { %v2576_v57 = vpop.xlane.xlu0 %2575 }
 0x754   : > { %v2581_v59 = vmul.f32 0.03125, %v2576_v57  ;;  %v2586_v60 = vmul.f32 %v2583_v56, %v2583_v56  ;;  %v2818_v57 = vld [vmem:[%s4310_s12 + $0x60] sm:$0xff] }
 0x756   : > { %v2584_v61 = vsub.f32 %v4742_v47, %v2581_v59  ;;  %v2589_v62 = vsel %vm916_vm1, %v2586_v60, 0.0  ;;  %v2819_v59 = vld [vmem:[%s4310_s12 + $0x68] sm:$0xff] }
 0x757   : > { %2590 = vadd.xlane.f32.xlu0 %v2589_v62  ;;  %v2579_v63 = vpop.xlane.xlu0 %2578  ;;  %v3753_v60 = vpack.c.bf16 %v2819_v59, %v2818_v57  ;;  %v2821_v62 = vld [vmem:[%s4310_s12 + $0x78] sm:$0xff] }
 0x758   : > { %v2582_v15 = vmul.f32 0.03125, %v2579_v63  ;;  %v2587_v2 = vmul.f32 %v2584_v61, %v2584_v61 }
 0x75a   : > { %v2585_v4 = vsub.f32 %v4746_v52, %v2582_v15  ;;  %v2592_v5 = vsel %vm916_vm1, %v2587_v2, 0.0  ;;  %v3280_v15 = vld [vmem:[%s891_s20] ss:$0 sm:$0xff] }
 0x75b   : > { %2593 = vadd.xlane.f32.xlu1 %v2592_v5 }
 0x75c   : > { %v2588_v6 = vmul.f32 %v2585_v4, %v2585_v4 }
 0x75e   : > { %v2595_v58 = vsel %vm916_vm1, %v2588_v6, 0.0 }
 0x75f   : > { %2596 = vadd.xlane.f32.xlu0 %v2595_v58 }
 0x7e4   : > { %v2591_v11 = vpop.xlane.xlu0 %2590 }
 0x7e5   : > { %v2598_v12 = vmul.f32 0.03125, %v2591_v11 }
 0x7e7   : > { %v2601_v13 = vadd.f32 1e-05, %v2598_v12 }
 0x7e8   : > { %v2594_v14 = vpop.xlane.xlu1 %2593 }
 0x7e9   : > { %3925 = vrsqrt.f32 %v2601_v13  ;;  %v2599_v16 = vmul.f32 0.03125, %v2594_v14 }
 0x7eb   : > { %v2602_v17 = vadd.f32 1e-05, %v2599_v16 }
 0x7ec   : > { %v2597_v3 = vpop.xlane.xlu0 %2596 }
 0x7ed   : > { %3927 = vrsqrt.f32 %v2602_v17  ;;  %v2600_v20 = vmul.f32 0.03125, %v2597_v3 }
 0x7ef   : > { %v2603_v21 = vadd.f32 1e-05, %v2600_v20 }
 0x7f1   : > { %3929 = vrsqrt.f32 %v2603_v21 }
 0x7f3   : > { %v3926_v18 = vpop.eup %3925 }
 0x7f4   : > { %v2607_v22 = vmul.f32 %v3926_v18, %v2583_v56  ;;  %v3750_v56 = vpack.c.bf16 %v2817_v55, %v2816_v54 }
 0x7f6   : > { %v2616_v25 = vmul.f32 %v3278_v19, %v2607_v22  ;;  %3751 = vmatpush3.bf16.msra.mxu0 %v3750_v56 }
 0x7f7   : > { %v3928_v26 = vpop.eup %3927  ;;  %3752 = vmatprep.subr.bf16.mxu0 %v4044_v27 }
 0x7f8   : > { %v2625_v28 = vadd.f32 %v3279_v23, %v2616_v25  ;;  %v2608_v29 = vmul.f32 %v3928_v26, %v2584_v61  ;;  %v2820_v61 = vld [vmem:[%s4310_s12 + $0x70] sm:$0xff] }
 0x7f9   : > { %v3756_v63 = vpack.c.bf16 %v2821_v62, %v2820_v61 }
 0x7fa   : > { %3633 = vmatmul.mubr.msk.f32.vlgmr.msra.gmra.mrb[50].mxu1 %vm916_vm1, %v2625_v28  ;;  %v2617_v30 = vmul.f32 %v3278_v19, %v2608_v29  ;;  %3754 = vmatpush3.bf16.msra.mxu0 %v3753_v60 }
 0x7fb   : > { %v3930_v31 = vpop.eup %3929  ;;  %3635 = vmatprep.mubr.msk.f32.mxu1 %vm4045_vm2, %v4046_v35  ;;  %3755 = vmatprep.subr.bf16.mxu0 %v4044_v27 }
 0x7fc   : > { %v2626_v32 = vadd.f32 %v3279_v23, %v2617_v30  ;;  %v2609_v24 = vmul.f32 %v3930_v31, %v2585_v4 }
 0x7fe   : > { %3636 = vmatmul.mubr.msk.f32.gmra.mrb[52].mxu1 %vm916_vm1, %v2626_v32  ;;  %v2618_v33 = vmul.f32 %v3278_v19, %v2609_v24  ;;  %3757 = vmatpush3.bf16.msra.mxu0 %v3756_v63 }
 0x7ff   : > { %3638 = vmatprep.mubr.msk.f32.mxu1 %vm4045_vm2, %v4046_v35 }
 0x800   : > { %v2627_v34 = vadd.f32 %v3279_v23, %v2618_v33 }
 0x802   : > { %3639 = vmatmul.mubr.msk.f32.gmra.mrb[54].mxu1 %vm916_vm1, %v2627_v34 }
 0x8cd   : > { %v2714_v2 = vpop.f32.mrb[50].mxu1 }
 0x8ce   : > { %v4806_v4 = vadd.f32 %v3280_v15, %v2714_v2  ;;  %v3634_v5 = vpop.f32.mrb[51].mxu1 }
 0x8cf   : > { %v4050_v5 = vmov -1.0  }
 0x8d0   : > { %v4809_v6 = vmul.f32 0.70710677, %v4806_v4 }
 0x8d1   : > { %v2719_v58 = vpop.f32.mrb[52].mxu1 }
 0x8d2   : > { %v2740_v7 = vand.u32 2147483647, %v4809_v6  ;;  %v4812_v27 = vadd.f32 %v3280_v15, %v2719_v58  ;;  %v3637_v0 = vpop.f32.mrb[53].mxu1  ;;  %vm2734_vm6 = vcmp.ge.f32.partialorder %v4809_v6, 0.0 }
 0x8d3   : > { %v2737_v58 = vsel %vm2734_vm6, 1.0, %v4050_v5 }
 0x8d4   : > { %v2743_v8 = vmul.f32 0.3275911, %v2740_v7  ;;  %v4815_v9 = vmul.f32 0.70710677, %v4812_v27  ;;  %v2779_v21 = vsub.f32 0.0, %v2740_v7 }
 0x8d5   : > { %v2724_v10 = vpop.f32.mrb[54].mxu1 }
 0x8d6   : > { %v2746_v1 = vadd.f32 1.0, %v2743_v8  ;;  %v2741_v11 = vand.u32 2147483647, %v4815_v9  ;;  %v3640_v12 = vpop.f32.mrb[55].mxu1  ;;  %v4818_v13 = vadd.f32 %v3280_v15, %v2724_v10  ;;  %v2782_v22 = vmul.f32 %v2779_v21, %v2740_v7 }
 0x8d7   : > { %vm2735_vm7 = vcmp.ge.f32.partialorder %v4815_v9, 0.0 }
 0x8d8   : > { %3931 = vrcp.f32 %v2746_v1  ;;  %v2744_v14 = vmul.f32 0.3275911, %v2741_v11  ;;  %v4821_v16 = vmul.f32 0.70710677, %v4818_v13  ;;  %v2780_v23 = vsub.f32 0.0, %v2741_v11 }
 0x8d9   : > { %v2785_v29 = vmul.f32 1.442695, %v2782_v22  ;;  %v2728_v1 = vmul.f32 0.5, %v4806_v4 }
 0x8da   : > { %v2747_v17 = vadd.f32 1.0, %v2744_v14  ;;  %v2742_v3 = vand.u32 2147483647, %v4821_v16  ;;  %v2783_v30 = vmul.f32 %v2780_v23, %v2741_v11  ;;  %v2738_v14 = vsel %vm2735_vm7, 1.0, %v4050_v5 }
 0x8db   : > { %vm2736_vm8 = vcmp.ge.f32.partialorder %v4821_v16, 0.0 }
 0x8dc   : > { %3933 = vrcp.f32 %v2747_v17  ;;  %v2745_v20 = vmul.f32 0.3275911, %v2742_v3  ;;  %v2781_v32 = vsub.f32 0.0, %v2742_v3  ;;  %v2787_v36 = vmul.f32 1.442695, %v2783_v30 }
 0x8dd   : > { %v2739_v4 = vsel %vm2736_vm8, 1.0, %v4050_v5 }
 0x8de   : > { %v2748_v18 = vadd.f32 1.0, %v2745_v20  ;;  %v2784_v40 = vmul.f32 %v2781_v32, %v2742_v3 }
 0x8e0   : > { %3935 = vrcp.f32 %v2748_v18  ;;  %v2789_v48 = vmul.f32 1.442695, %v2784_v40  ;;  %v2729_v18 = vmul.f32 0.5, %v4812_v27  ;;  %v3284_v27 = vld [vmem:[%s899_s11] ss:$0 sm:$0xff]  ;;  %s5010_s11 = sld [smem:[#allocation9_spill]] }
 0x8e1   : > { %3937 = vpow2.f32 %v2785_v29 }
 0x8e2   : > { %v3932_v19 = vpop.eup %3931  ;;  %3939 = vpow2.f32 %v2787_v36 }
 0x8e3   : > { %v2752_v25 = vmul.f32 1.0614054, %v3932_v19  ;;  %3941 = vpow2.f32 %v2789_v48 }
 0x8e5   : > { %v2755_v26 = vadd.f32 -1.4531521, %v2752_v25  ;;  %v2730_v25 = vmul.f32 0.5, %v4818_v13 }
 0x8e6   : > { %v3934_v28 = vpop.eup %3933  ;;  %p3285_p1 = scmp.ne.s32.totalorder %s5010_s11, 1 }
 0x8e7   : > { %v2758_v31 = vmul.f32 %v3932_v19, %v2755_v26  ;;  %v2753_v24 = vmul.f32 1.0614054, %v3934_v28  ;;  %s5011_s2 = sld [smem:[#allocation32_spill]] (!%p3285_p1)  ;;  %s5012_s29 = sld [smem:[#allocation33_spill]] (!%p3285_p1) }
 0x8e9   : > { %v2761_v33 = vadd.f32 1.4214138, %v2758_v31  ;;  %v2756_v34 = vadd.f32 -1.4531521, %v2753_v24 }
 0x8ea   : > { %v3936_v38 = vpop.eup %3935 }
 0x8eb   : > { %v2764_v39 = vmul.f32 %v3932_v19, %v2761_v33  ;;  %v2759_v41 = vmul.f32 %v3934_v28, %v2756_v34  ;;  %v2754_v42 = vmul.f32 1.0614054, %v3936_v38  ;;  %v3938_v57 = vpop.eup %3937 }
 0x8ec   : > { %v3940_v2 = vpop.eup %3939 }
 0x8ed   : > { %v2767_v43 = vadd.f32 -0.28449672, %v2764_v39  ;;  %v2762_v44 = vadd.f32 1.4214138, %v2759_v41  ;;  %v2757_v45 = vadd.f32 -1.4531521, %v2754_v42  ;;  %v3942_v17 = vpop.eup %3941 }
 0x8ef   : > { %v2770_v46 = vmul.f32 %v3932_v19, %v2767_v43  ;;  %v2765_v49 = vmul.f32 %v3934_v28, %v2762_v44  ;;  %v2760_v50 = vmul.f32 %v3936_v38, %v2757_v45 }
 0x8f1   : > { %v2773_v51 = vadd.f32 0.2548296, %v2770_v46  ;;  %v2768_v53 = vadd.f32 -0.28449672, %v2765_v49  ;;  %v2763_v54 = vadd.f32 1.4214138, %v2760_v50 }
 0x8f2   : > { %v3286_v46 = vld [vmem:[%s5011_s2] ss:$0 sm:$0xff] (!%p3285_p1) }
 0x8f3   : > { %v2776_v55 = vmul.f32 %v3932_v19, %v2773_v51  ;;  %v2771_v56 = vmul.f32 %v3934_v28, %v2768_v53  ;;  %v2766_v59 = vmul.f32 %v3936_v38, %v2763_v54  ;;  %v3287_v49 = vld [vmem:[%s5012_s29] ss:$0 sm:$0xff] (!%p3285_p1) }
 0x8f5   : > { %v2791_v60 = vmul.f32 %v3938_v57, %v2776_v55  ;;  %v2774_v61 = vadd.f32 0.2548296, %v2771_v56  ;;  %v2769_v62 = vadd.f32 -0.28449672, %v2766_v59 }
 0x8f7   : > { %v2794_v63 = vsub.f32 1.0, %v2791_v60  ;;  %v2777_v15 = vmul.f32 %v3934_v28, %v2774_v61  ;;  %v2772_v7 = vmul.f32 %v3936_v38, %v2769_v62 }
 0x8f9   : > { %v2797_v0 = vmul.f32 %v2794_v63, %v2737_v58  ;;  %v2792_v8 = vmul.f32 %v3940_v2, %v2777_v15  ;;  %v2775_v10 = vadd.f32 0.2548296, %v2772_v7 }
 0x8fb   : > { %v2800_v11 = vadd.f32 1.0, %v2797_v0  ;;  %v2795_v12 = vsub.f32 1.0, %v2792_v8  ;;  %v2778_v6 = vmul.f32 %v3936_v38, %v2775_v10 }
 0x8fd   : > { %v2803_v3 = vmul.f32 %v2800_v11, %v2728_v1  ;;  %v2798_v20 = vmul.f32 %v2795_v12, %v2738_v14  ;;  %v2793_v21 = vmul.f32 %v3942_v17, %v2778_v6 }
 0x8ff   : > { %3674 = vmatmul.mubr.f32.vlgmr.msra.gmra.mrb[40].mxu0 %v2803_v3  ;;  %v2801_v19 = vadd.f32 1.0, %v2798_v20  ;;  %v2796_v9 = vsub.f32 1.0, %v2793_v21 }
 0x900   : > { %3676 = vmatprep.mubr.msk.f32.mxu0 %vm4045_vm2, %v4046_v35 }
 0x901   : > { %v2804_v22 = vmul.f32 %v2801_v19, %v2729_v18  ;;  %v2799_v23 = vmul.f32 %v2796_v9, %v2739_v4 }
 0x903   : > { %3677 = vmatmul.mubr.f32.gmra.mrb[42].mxu0 %v2804_v22  ;;  %v2802_v16 = vadd.f32 1.0, %v2799_v23 }
 0x904   : > { %3679 = vmatprep.mubr.msk.f32.mxu0 %vm4045_vm2, %v4046_v35 }
 0x905   : > { %v2805_v26 = vmul.f32 %v2802_v16, %v2730_v25 }
 0x907   : > { %3680 = vmatmul.mubr.f32.gmra.mrb[44].mxu0 %v2805_v26 }
 0x9d2   : > { %v2895_v28 = vpop.f32.mrb[40].mxu0 }
 0x9d3   : > { %v2896_v29 = vadd.f32 %v3284_v27, %v2895_v28  ;;  %v3675_v30 = vpop.f32.mrb[41].mxu0 }
 0x9d5   : > { %v2909_v31 = vadd.f32 %v2896_v29, %v4738_v37 }
 0x9d6   : > { %v2900_v32 = vpop.f32.mrb[42].mxu0 }
 0x9d7   : > { %2912 = vst.msk [vmem:[#allocation2] sm:$0xff] %vm916_vm1, %v2909_v31  ;;  %v2901_v13 = vadd.f32 %v3284_v27, %v2900_v32  ;;  %v3678_v24 = vpop.f32.mrb[43].mxu0 }
 0x9d9   : > { %v2910_v35 = vadd.f32 %v2901_v13, %v4742_v47  ;;  %2918 = sbr.rel (%p3285_p1) target bundleno = 2837 (0xb15), region = 108 }
 0x9da   : > { %v2905_v33 = vpop.f32.mrb[44].mxu0 }
 0x9db   : > { %2913 = vst.msk [vmem:[#allocation2 + $0x8] sm:$0xff] %vm916_vm1, %v2910_v35  ;;  %v2906_v34 = vadd.f32 %v3284_v27, %v2905_v33  ;;  %v3681_v36 = vpop.f32.mrb[45].mxu0  ;;  %v2921_v37 = vsel (!%p3285_p1), %vm916_vm1, %v2910_v35, 0.0 }
 0x9dc   : > { %2922 = vadd.xlane.f32.xlu0 (!%p3285_p1), %v2921_v37 }
 0x9dd   : > { %v2911_v38 = vadd.f32 %v2906_v34, %v4746_v52 }
 0x9df   : > { %2914 = vst.msk [vmem:[#allocation2 + $0x10] sm:$0xff] %vm916_vm1, %v2911_v38 }
 0xa69   : > { %v2923_v39 = vpop.xlane.xlu0 %2922 }
 0xa6a   : > { %v2924_v40 = vmul.f32 0.03125, %v2923_v39 }
 0xa6c   : > { %v2925_v41 = vsub.f32 %v2910_v35, %v2924_v40 }
 0xa6e   : > { %v2926_v47 = vmul.f32 %v2925_v41, %v2925_v41 }
 0xa70   : > { %v2927_v42 = vsel %vm916_vm1, %v2926_v47, 0.0 }
 0xa71   : > { %2928 = vadd.xlane.f32.xlu0 %v2927_v42 }
 0xafe   : > { %v2929_v43 = vpop.xlane.xlu0 %2928 }
 0xaff   : > { %v2930_v44 = vmul.f32 0.03125, %v2929_v43 }
 0xb01   : > { %v2931_v45 = vadd.f32 1e-05, %v2930_v44 }
 0xb03   : > { %3946 = vrsqrt.f32 %v2931_v45 }
 0xb0d   : > { %v3947_v52 = vpop.eup %3946 }
 0xb0e   : > { %v2933_v48 = vmul.f32 %v3947_v52, %v2925_v41 }
 0xb10   : > { %v2940_v50 = vmul.f32 %v3286_v46, %v2933_v48 }
 0xb12   : > { %v2947_v51 = vadd.f32 %v3287_v49, %v2940_v50 }
 0xb14   : > { %2948 = vst.msk [vmem:[%s834_s30] sm:$0xff] %vm916_vm1, %v2947_v51 }
 0xb15 PF: > { %s5013_s27 = sld [smem:[#allocation10_spill]]  ;;  %s5014_s3 = sld [smem:[#allocation7_spill]] }
 0xb16   : > { %s5016_s21 = sld [smem:[#allocation34_spill]]  ;;  %s2963_s5 = sshll.u32 %s834_s30, 4  ;;  %s2964_s5 = int_to_ptr.vmem [resolvable:$true] %s2963_s5 }
 0xb17   : > { %s3948_s8 = scalar_lea.vmem %s2964_s5, 128  ;;  %s4051_s18 = smov [#allocation3]  }
 0xb18   : > { %p3949_p2 = scmp.ne.s32.totalorder %s2964_s5, %s3948_s8  ;;  %s3952_s12 = sshll.u32 %s4051_s18, 4  ;;  %s3953_s12 = int_to_ptr.vmem [resolvable:$false] %s3952_s12 }
 0xb19   : > { %s3954_s20 = scalar_lea.vmem %s3953_s12, 256  ;;  %p3955_p6 = scmp.lt.s32.totalorder %s2964_s5, %s3953_s12 }
 0xb1a   : > { %p3950_p4 = pnand %p3949_p2, %p4206_p3  ;;  %p3956_p7 = scmp.lt.s32.totalorder %s3954_s20, %s3948_s8 }
 0xb1b   : > { %s3289_s23 = sshll.u32 %s5013_s27, 7  ;;  %s5017_s6 = sand.u32 1, %s5014_s3  }
 0xb1c   : > { %s4861_s24 = scalar_lea.hbm %s5016_s21, %s3289_s23  ;;  %s2950_s10 = scalar_lea.sflag [#allocation4], %s5017_s6 }
 0xb1d   : > { %p3951_p5 = pneg %p3950_p4  ;;  %p3957_p8 = por %p3956_p7, %p3955_p6 }
 0xb1f   : > { %p3958_p10 = pnand %p3957_p8, %p3951_p5 }
 0xb21   : > { %3961 = shalt.err (!%p3958_p10)
}
 0xb22   : > { %s3962_s25 = scalar_lea.hbm %s4861_s24, 128  ;;  %s3966_s11 = scalar_lea.hbm %s5016_s21, 256 }
 0xb23   : > { %p3963_p11 = scmp.ne.s32.totalorder %s4861_s24, %s3962_s25  ;;  %p3967_p0 = scmp.lt.u32.totalorder %s4861_s24, %s5016_s21 }
 0xb24   : > { %p3968_p1 = scmp.lt.u32.totalorder %s3966_s11, %s3962_s25  ;;  %p3970_p4 = scmp.lt.u32.totalorder %s3962_s25, %s4861_s24 }
 0xb25   : > { %p3964_p12 = pnand %p3963_p11, %p4206_p3 }
 0xb26   : > { %p3969_p2 = por %p3968_p1, %p3967_p0 }
 0xb27   : > { %p3965_p13 = pneg %p3964_p12 }
 0xb28   : > { %p3971_p5 = por %p3970_p4, %p3969_p2 }
 0xb2a   : > { %p3972_p6 = pnand %p3971_p5, %p3965_p13 }
 0xb2c   : > { %3975 = shalt.err (!%p3972_p6)
}
 0xb2d   : > { %3763 = dma.vmem_to_hbm [thread:$0]  (%p4206_p3), %s2964_s5, 128, %s4861_s24, %s2950_s10  }
 0xb2e PF: > { %s5018_s2 = sld [smem:[#allocation13_spill]]  ;;  %s5019_s26 = sld [smem:[#allocation6_spill]] }
 0xb34   : > { %p3769_p7 = scmp.ge.s32.totalorder %s5018_s2, 2  ;;  %s2975_s29 = sand.u32 1, %s5019_s26  }
 0xb35   : > { %s2976_s27 = scalar_lea.sflag [#allocation4], %s2975_s29 }
 0xb36   : > { %p3766_p8 = pnand %p3769_p7, %p4216_p9 }
 0xb38   : > { %4009 = dma.done.wait (!%p3766_p8), %s2976_s27, 128  }
 0xb39   : > { %4011 = vsyncadd (!%p3766_p8), %s2976_s27, 4294967168  ;;  %s33_s26 = sadd.s32 1, %s5018_s2   ;;  %s5021_s1 = sld [smem:[#allocation7_spill]] }
 0xb3a   : > { %p30_p10 = scmp.ge.s32.totalorder %s33_s26, 6   ;;  %s5022_s22 = sld [smem:[#allocation8_spill]] }
 0xb3b   : > { %s5023_s23 = sld [smem:[#allocation18_spill]]  ;;  %s5024_s24 = sld [smem:[#allocation11_spill]] }
 0xb3c   : > { %s5025_s2 = sld [smem:[#allocation12_spill]]  ;;  %s5026_s25 = sld [smem:[#allocation14_spill]] }
 0xb3d   : > { %s5027_s3 = sld [smem:[#allocation16_spill]]  ;;  %32 = sbr.rel (!%p30_p10) target bundleno = 22 (0x16), region = 191 }
 0xb44   :  { %2981 = vsyncpa [#allocation4], 1 }
 0xb45   :  { %2983 = vsyncpa [#allocation4 + $0x1], 1 }

</bundles_post_ra>
